<compile_context>
chip_gen: v7x
topology: tpu7x:2x2x1
jax: 0.10.0
libtpu: 0.0.40
codegen_flags: <defaults>
</compile_context>

<pallas_src>
import functools

import jax
import jax.numpy as jnp
from jax import lax
from jax.experimental import pallas as pl
from jax.experimental.pallas import tpu as pltpu


_VMEM_LIMIT = 40 * 1024 * 1024   # <= v7x's 64 MiB physical; fine on v5e/v6e.
_LEAK = 0.2                      # LeakyReLU negative slope.


# ---------------------------------------------------------------------------
# helpers
# ---------------------------------------------------------------------------
def _round_up(x, m):
    return ((x + m - 1) // m) * m


def _largest_tile(dim, cap, quantum=128):
    """Largest multiple of `quantum` that divides `dim` and is <= `cap`.

    `dim` must be a positive multiple of `quantum` (so `quantum` always works).
    """
    best = quantum
    t = quantum
    lim = min(dim, cap)
    while t <= lim:
        if dim % t == 0:
            best = t
        t += quantum
    return best


def _pick_tiles(m, k, cout):
    """Choose (tm, m_pad, tk, k_pad, tn, c_pad) for the tiled conv-matmul."""
    tm = min(1024, _round_up(m, 8))          # sublane-aligned M tile
    m_pad = _round_up(m, tm)
    k_pad = _round_up(k, 128)                # already a multiple of 128 in practice
    tk = _largest_tile(k_pad, 2048)          # exact divisor -> no extra K pad
    c_pad = _round_up(cout, 128)             # lane-dense output
    tn = _largest_tile(c_pad, 512)           # exact divisor -> no extra N pad
    return tm, m_pad, tk, k_pad, tn, c_pad


# ---------------------------------------------------------------------------
# Pallas kernels
# ---------------------------------------------------------------------------
def _mm_single_kernel(p_ref, w_ref, y_ref, *, act):
    """Single-K-tile matmul; optional fused LeakyReLU(0.2). No scratch."""
    x = jnp.dot(p_ref[...], w_ref[...], preferred_element_type=jnp.float32)
    if act:
        x = jnp.maximum(x, _LEAK * x)
    y_ref[...] = x.astype(y_ref.dtype)


def _mm_multi_kernel(p_ref, w_ref, y_ref, acc_ref, *, act):
    """Multi-K-tile matmul with f32 VMEM accumulator; optional fused act."""
    k = pl.program_id(2)

    @pl.when(k == 0)
    def _():
        acc_ref[...] = jnp.zeros_like(acc_ref)

    acc_ref[...] += jnp.dot(p_ref[...], w_ref[...],
                            preferred_element_type=jnp.float32)

    @pl.when(k == pl.num_programs(2) - 1)
    def _():
        x = acc_ref[...]
        if act:
            x = jnp.maximum(x, _LEAK * x)
        y_ref[...] = x.astype(y_ref.dtype)


def _mm_stats_single_kernel(p_ref, w_ref, y_ref, stats_ref):
    """Single-K matmul emitting bf16 y plus f32 per-channel sum / sumsq."""
    x = jnp.dot(p_ref[...], w_ref[...], preferred_element_type=jnp.float32)
    y_ref[...] = x.astype(y_ref.dtype)
    stats_ref[0, 0:1, :] = jnp.sum(x, axis=0, keepdims=True)
    stats_ref[0, 1:2, :] = jnp.sum(x * x, axis=0, keepdims=True)


def _mm_stats_multi_kernel(p_ref, w_ref, y_ref, stats_ref, acc_ref):
    """Multi-K matmul with accumulator, emitting y (bf16) + f32 stats."""
    k = pl.program_id(2)

    @pl.when(k == 0)
    def _():
        acc_ref[...] = jnp.zeros_like(acc_ref)

    acc_ref[...] += jnp.dot(p_ref[...], w_ref[...],
                            preferred_element_type=jnp.float32)

    @pl.when(k == pl.num_programs(2) - 1)
    def _():
        x = acc_ref[...]
        y_ref[...] = x.astype(y_ref.dtype)
        stats_ref[0, 0:1, :] = jnp.sum(x, axis=0, keepdims=True)
        stats_ref[0, 1:2, :] = jnp.sum(x * x, axis=0, keepdims=True)


def _bn_act_kernel(y_ref, scale_ref, shift_ref, o_ref):
    """Folded BatchNorm affine (x*scale + shift) + LeakyReLU(0.2)."""
    x = y_ref[...].astype(jnp.float32) * scale_ref[...] + shift_ref[...]
    o_ref[...] = jnp.maximum(x, _LEAK * x).astype(o_ref.dtype)


# ---------------------------------------------------------------------------
# pallas_call wrappers
# ---------------------------------------------------------------------------
def _matmul_call(patches, w_mat, *, tm, tk, tn, out_dtype, act, with_stats):
    m_pad, k_pad = patches.shape
    _, c_pad = w_mat.shape
    nk = k_pad // tk
    grid = (m_pad // tm, c_pad // tn, nk)
    single_k = (nk == 1)

    in_specs = [
        pl.BlockSpec((tm, tk), lambda i, j, kk: (i, kk)),
        pl.BlockSpec((tk, tn), lambda i, j, kk: (kk, j)),
    ]
    y_spec = pl.BlockSpec((tm, tn), lambda i, j, kk: (i, j))
    scratch = [] if single_k else [pltpu.VMEM((tm, tn), jnp.float32)]
    cparams = pltpu.CompilerParams(
        dimension_semantics=("parallel", "parallel", "arbitrary"),
        vmem_limit_bytes=_VMEM_LIMIT,
    )
    out_bytes = jnp.dtype(out_dtype).itemsize
    cost = pl.CostEstimate(
        flops=2 * m_pad * k_pad * c_pad,
        transcendentals=0,
        bytes_accessed=(m_pad * k_pad * 2 + k_pad * c_pad * 2
                        + m_pad * c_pad * out_bytes),
    )

    if with_stats:
        n_m_tiles = m_pad // tm
        kernel = _mm_stats_single_kernel if single_k else _mm_stats_multi_kernel
        return pl.pallas_call(
            kernel,
            out_shape=(
                jax.ShapeDtypeStruct((m_pad, c_pad), out_dtype),
                jax.ShapeDtypeStruct((n_m_tiles, 2, c_pad), jnp.float32),
            ),
            grid=grid,
            in_specs=in_specs,
            out_specs=(
                y_spec,
                pl.BlockSpec((1, 2, tn), lambda i, j, kk: (i, 0, j)),
            ),
            scratch_shapes=scratch,
            compiler_params=cparams,
            cost_estimate=cost,
        )(patches, w_mat)

    kernel = functools.partial(
        _mm_single_kernel if single_k else _mm_multi_kernel, act=act)
    return pl.pallas_call(
        kernel,
        out_shape=jax.ShapeDtypeStruct((m_pad, c_pad), out_dtype),
        grid=grid,
        in_specs=in_specs,
        out_specs=y_spec,
        scratch_shapes=scratch,
        compiler_params=cparams,
        cost_estimate=cost,
    )(patches, w_mat)


def _bn_act_call(y, scale, shift, *, tm, tn, out_dtype):
    m_pad, c_pad = y.shape
    grid = (m_pad // tm, c_pad // tn)
    return pl.pallas_call(
        _bn_act_kernel,
        out_shape=jax.ShapeDtypeStruct((m_pad, c_pad), out_dtype),
        grid=grid,
        in_specs=[
            pl.BlockSpec((tm, tn), lambda i, j: (i, j)),
            pl.BlockSpec((1, tn), lambda i, j: (0, j)),
            pl.BlockSpec((1, tn), lambda i, j: (0, j)),
        ],
        out_specs=pl.BlockSpec((tm, tn), lambda i, j: (i, j)),
        compiler_params=pltpu.CompilerParams(
            dimension_semantics=("parallel", "parallel"),
            vmem_limit_bytes=_VMEM_LIMIT,
        ),
    )(y, scale, shift)


# ---------------------------------------------------------------------------
# im2col (wrapper-side layout work) and the per-layer conv
# ---------------------------------------------------------------------------
def _im2col(x_nhwc, kh, kw, stride, pad):
    if pad > 0:
        x_nhwc = jnp.pad(x_nhwc, ((0, 0), (pad, pad), (pad, pad), (0, 0)))
    n, h, w, c = x_nhwc.shape
    oh = (h - kh) // stride + 1
    ow = (w - kw) // stride + 1
    pieces = []
    for i in range(kh):
        for j in range(kw):
            pieces.append(
                x_nhwc[:, i: i + stride * oh: stride, j: j + stride * ow: stride, :]
            )
    # feature index = (i*kw + j)*C + c
    patches = jnp.concatenate(pieces, axis=-1).reshape(n * oh * ow, kh * kw * c)
    return patches, (n, oh, ow)


def conv_layer(x_nhwc, w_oihw, gamma, beta, *, stride, pad, use_bn, use_act,
               out_dtype=jnp.bfloat16, eps=1e-5):
    cout, cin, kh, kw = w_oihw.shape
    assert x_nhwc.shape[-1] == cin

    # Pad channels on the (small) NHWC activation so K = kh*kw*cin_p is a
    # multiple of 128 -> the im2col patch matrix never needs a K-padding copy.
    cin_p = _round_up(cin, 8)
    x = x_nhwc.astype(jnp.bfloat16)
    if cin_p != cin:
        x = jnp.pad(x, ((0, 0), (0, 0), (0, 0), (0, cin_p - cin)))

    patches, (n, oh, ow) = _im2col(x, kh, kw, stride, pad)
    m, k = patches.shape
    tm, m_pad, tk, k_pad, tn, c_pad = _pick_tiles(m, k, cout)

    if (m_pad, k_pad) != (m, k):
        patches = jnp.pad(patches, ((0, m_pad - m), (0, k_pad - k)))

    # weights: (Cout,Cin,KH,KW) -> (KH,KW,Cin_p,Cout_pad) -> (K_pad, Cout_pad)
    w_mat = jnp.transpose(w_oihw, (2, 3, 1, 0))
    w_mat = jnp.pad(w_mat, ((0, 0), (0, 0), (0, cin_p - cin), (0, c_pad - cout)))
    w_mat = w_mat.reshape(kh * kw * cin_p, c_pad)
    if k_pad != k:
        w_mat = jnp.pad(w_mat, ((0, k_pad - k), (0, 0)))
    w_mat = w_mat.astype(jnp.bfloat16)

    if use_bn:
        # Pass A: conv matmul (bf16 y) + f32 per-tile channel sum / sumsq.
        y, stats = _matmul_call(patches, w_mat, tm=tm, tk=tk, tn=tn,
                                out_dtype=jnp.bfloat16, act=False,
                                with_stats=True)
        # Tiny combine in XLA: zero-padded rows contribute 0 to both sums, so
        # dividing by the true M gives exact batch statistics (biased var),
        # matching PyTorch training-mode BatchNorm2d with eps=1e-5.
        total = jnp.sum(stats, axis=0)                      # (2, c_pad), f32
        mean = total[0, :cout] / m
        var = jnp.maximum(total[1, :cout] / m - mean * mean, 0.0)
        # TODO(synk): E[x^2]-E[x]^2 can cancel for large per-channel means; a
        # mean-shifted second stats pass would be sturdier if drift shows.
        scale = gamma * lax.rsqrt(var + eps)                # fold BN affine
        shift = beta - mean * scale
        scale = jnp.pad(scale, (0, c_pad - cout)).reshape(1, c_pad)
        shift = jnp.pad(shift, (0, c_pad - cout)).reshape(1, c_pad)
        # Pass B: lane-dense normalize + LeakyReLU (BN layers always have act).
        out = _bn_act_call(y, scale, shift, tm=tm, tn=tn, out_dtype=out_dtype)
    else:
        out = _matmul_call(patches, w_mat, tm=tm, tk=tk, tn=tn,
                           out_dtype=out_dtype, act=use_act, with_stats=False)

    return out[:m, :cout].reshape(n, oh, ow, cout)


# ---------------------------------------------------------------------------
# Net_D: parameters + forward
# ---------------------------------------------------------------------------
def init_params(key, ndf, nc, l):
    """Deterministic synthetic parameters matching Net_D(ndf, nc, l)."""
    keys = jax.random.split(key, l)
    ws, gammas, betas = [], [], []
    # layer 0: Conv2d(nc, ndf, 4, 2, 1, bias=False)
    ws.append(0.05 * jax.random.normal(keys[0], (ndf, nc, 4, 4), jnp.float32))
    gammas.append(jnp.ones((ndf,), jnp.float32))
    betas.append(jnp.zeros((ndf,), jnp.float32))
    # layers 1..l-2: Conv2d(ndf*2^(i-1), ndf*2^i, 4, 2, 1) + BN + LeakyReLU
    for i in range(1, l - 1):
        cin = ndf * 2 ** (i - 1)
        cout = ndf * 2 ** i
        ws.append(0.05 * jax.random.normal(keys[i], (cout, cin, 4, 4), jnp.float32))
        gammas.append(jnp.ones((cout,), jnp.float32))   # PyTorch BN default weight
        betas.append(jnp.zeros((cout,), jnp.float32))   # PyTorch BN default bias
    # layer l-1: Conv2d(ndf*2^(l-2), 1, 8, 1, 0, bias=False)
    cin = ndf * 2 ** (l - 2)
    ws.append(0.05 * jax.random.normal(keys[l - 1], (1, cin, 8, 8), jnp.float32))
    gammas.append(jnp.ones((1,), jnp.float32))
    betas.append(jnp.zeros((1,), jnp.float32))
    return ws, gammas, betas


def net_d_forward(x_nchw, ws, gammas, betas):
    l = len(ws)
    x = jnp.transpose(x_nchw, (0, 2, 3, 1)).astype(jnp.float32)  # NCHW -> NHWC
    # layer 0: conv + LeakyReLU (no BN), fused in a single pass
    x = conv_layer(x, ws[0], gammas[0], betas[0],
                   stride=2, pad=1, use_bn=False, use_act=True,
                   out_dtype=jnp.bfloat16)
    # middle layers: conv + BatchNorm(batch stats) + LeakyReLU (two passes)
    for i in range(1, l - 1):
        x = conv_layer(x, ws[i], gammas[i], betas[i],
                       stride=2, pad=1, use_bn=True, use_act=True,
                       out_dtype=jnp.bfloat16)
    # final layer: conv 8x8, stride 1, no pad, no BN/act -> (N, 1, 1, 1)
    x = conv_layer(x, ws[l - 1], gammas[l - 1], betas[l - 1],
                   stride=1, pad=0, use_bn=False, use_act=False,
                   out_dtype=jnp.float32)
    # equivalent of input.view(-1, 1).squeeze(1)
    return x.reshape(-1).astype(jnp.float32)


if __name__ == "__main__":
    # Small shapes consistent with the module: l=3 -> spatial 32 -> 16 -> 8 -> 1.
    ndf, nc, l = 8, 4, 3
    batch, spatial = 2, 32

    key = jax.random.PRNGKey(0)
    k_in, k_par = jax.random.split(key)
    x = jax.random.normal(k_in, (batch, nc, spatial, spatial), jnp.float32)  # NCHW

    ws, gammas, betas = init_params(k_par, ndf, nc, l)

    fwd = jax.jit(net_d_forward)
    out = jax.block_until_ready(fwd(x, ws, gammas, betas))
    assert out.shape == (batch,), out.shape
    assert bool(jnp.all(jnp.isfinite(out)))
    print("KERNEL_OK")
</pallas_src>

<mosaic_0001>
module attributes {stable_mosaic.version = 11 : i64} {
  func.func @_mm_single_kernel(%arg0: i32, %arg1: i32, %arg2: i32, %arg3: memref<512x128xbf16, #tpu.memory_space<vmem>>, %arg4: memref<128x128xbf16, #tpu.memory_space<vmem>>, %arg5: memref<512x128xbf16, #tpu.memory_space<vmem>>) attributes {dimension_semantics = [#tpu.dimension_semantics<parallel>, #tpu.dimension_semantics<parallel>, #tpu.dimension_semantics<arbitrary>], iteration_bounds = array<i64: 1, 1, 1>, scalar_prefetch = 0 : i64, scratch_operands = 0 : i64, tpu.core_type = #tpu.core_type<tc>, window_params = [{transform_indices = @transform_0, window_bounds = array<i64: 512, 128>}, {transform_indices = @transform_1, window_bounds = array<i64: 128, 128>}, {transform_indices = @transform_2, window_bounds = array<i64: 512, 128>}]} {
    %c0 = arith.constant 0 : index
    %c0_0 = arith.constant 0 : index
    %0 = vector.load %arg3[%c0, %c0_0] : memref<512x128xbf16, #tpu.memory_space<vmem>>, vector<512x128xbf16>
    %c0_1 = arith.constant 0 : index
    %c0_2 = arith.constant 0 : index
    %1 = vector.load %arg4[%c0_1, %c0_2] : memref<128x128xbf16, #tpu.memory_space<vmem>>, vector<128x128xbf16>
    %cst = arith.constant dense<0.000000e+00> : vector<512x128xf32>
    %2 = tpu.matmul %0, %1, %cst {dimension_numbers = #tpu.dot_dimension_numbers<[1], [0], [0], [1], [0, 0, 1, 1], [], []>} : vector<512x128xbf16>, vector<128x128xbf16>, vector<512x128xf32> -> vector<512x128xf32>
    %cst_3 = arith.constant 2.000000e-01 : f32
    %3 = vector.broadcast %cst_3 : f32 to vector<512x128xf32>
    %4 = arith.mulf %3, %2 : vector<512x128xf32>
    %5 = arith.maximumf %2, %4 : vector<512x128xf32>
    %6 = arith.truncf %5 : vector<512x128xf32> to vector<512x128xbf16>
    %c0_4 = arith.constant 0 : index
    %c0_5 = arith.constant 0 : index
    %7 = vector.load %arg5[%c0_4, %c0_5] : memref<512x128xbf16, #tpu.memory_space<vmem>>, vector<512x128xbf16>
    tpu.vector_store %arg5[%c0_4, %c0_5], %6 {strides = array<i32>} : memref<512x128xbf16, #tpu.memory_space<vmem>>, vector<512x128xbf16>,
    return
  }
  func.func @transform_0(%arg0: i32, %arg1: i32, %arg2: i32) -> (i32, i32) {
    %c0_i32 = arith.constant 0 : i32
    return %arg0, %arg2 : i32, i32
  }
  func.func @transform_1(%arg0: i32, %arg1: i32, %arg2: i32) -> (i32, i32) {
    %c0_i32 = arith.constant 0 : i32
    return %arg2, %arg1 : i32, i32
  }
  func.func @transform_2(%arg0: i32, %arg1: i32, %arg2: i32) -> (i32, i32) {
    %c0_i32 = arith.constant 0 : i32
    return %arg0, %arg1 : i32, i32
  }
}

module attributes {stable_mosaic.version = 11 : i64} {
  func.func @_mm_stats_single_kernel(%arg0: i32, %arg1: i32, %arg2: i32, %arg3: memref<128x128xbf16, #tpu.memory_space<vmem>>, %arg4: memref<128x128xbf16, #tpu.memory_space<vmem>>, %arg5: memref<128x128xbf16, #tpu.memory_space<vmem>>, %arg6: memref<1x2x128xf32, #tpu.memory_space<vmem>>) attributes {dimension_semantics = [#tpu.dimension_semantics<parallel>, #tpu.dimension_semantics<parallel>, #tpu.dimension_semantics<arbitrary>], iteration_bounds = array<i64: 1, 1, 1>, scalar_prefetch = 0 : i64, scratch_operands = 0 : i64, tpu.core_type = #tpu.core_type<tc>, window_params = [{transform_indices = @transform_0, window_bounds = array<i64: 128, 128>}, {transform_indices = @transform_1, window_bounds = array<i64: 128, 128>}, {transform_indices = @transform_2, window_bounds = array<i64: 128, 128>}, {transform_indices = @transform_3, window_bounds = array<i64: 1, 2, 128>}]} {
    %c0 = arith.constant 0 : index
    %c0_0 = arith.constant 0 : index
    %0 = vector.load %arg3[%c0, %c0_0] : memref<128x128xbf16, #tpu.memory_space<vmem>>, vector<128x128xbf16>
    %c0_1 = arith.constant 0 : index
    %c0_2 = arith.constant 0 : index
    %1 = vector.load %arg4[%c0_1, %c0_2] : memref<128x128xbf16, #tpu.memory_space<vmem>>, vector<128x128xbf16>
    %cst = arith.constant dense<0.000000e+00> : vector<128x128xf32>
    %2 = tpu.matmul %0, %1, %cst {dimension_numbers = #tpu.dot_dimension_numbers<[1], [0], [0], [1], [0, 0, 1, 1], [], []>} : vector<128x128xbf16>, vector<128x128xbf16>, vector<128x128xf32> -> vector<128x128xf32>
    %3 = arith.truncf %2 : vector<128x128xf32> to vector<128x128xbf16>
    %c0_3 = arith.constant 0 : index
    %c0_4 = arith.constant 0 : index
    %4 = vector.load %arg5[%c0_3, %c0_4] : memref<128x128xbf16, #tpu.memory_space<vmem>>, vector<128x128xbf16>
    tpu.vector_store %arg5[%c0_3, %c0_4], %3 {strides = array<i32>} : memref<128x128xbf16, #tpu.memory_space<vmem>>, vector<128x128xbf16>,
    %cst_5 = arith.constant dense<0.000000e+00> : vector<128xf32>
    %5 = vector.multi_reduction <add>, %2, %cst_5 [0] : vector<128x128xf32> to vector<128xf32>
    %6 = vector.shape_cast %5 : vector<128xf32> to vector<1x128xf32>
    %c0_6 = arith.constant 0 : index
    %c0_7 = arith.constant 0 : index
    %c0_8 = arith.constant 0 : index
    %7 = vector.load %arg6[%c0_6, %c0_7, %c0_8] : memref<1x2x128xf32, #tpu.memory_space<vmem>>, vector<1x1x128xf32>
    %8 = vector.shape_cast %7 : vector<1x1x128xf32> to vector<1x128xf32>
    %9 = vector.shape_cast %6 : vector<1x128xf32> to vector<1x1x128xf32>
    tpu.vector_store %arg6[%c0_6, %c0_7, %c0_8], %9 {strides = array<i32>} : memref<1x2x128xf32, #tpu.memory_space<vmem>>, vector<1x1x128xf32>,
    %10 = arith.mulf %2, %2 : vector<128x128xf32>
    %cst_9 = arith.constant dense<0.000000e+00> : vector<128xf32>
    %11 = vector.multi_reduction <add>, %10, %cst_9 [0] : vector<128x128xf32> to vector<128xf32>
    %12 = vector.shape_cast %11 : vector<128xf32> to vector<1x128xf32>
    %c0_10 = arith.constant 0 : index
    %c1 = arith.constant 1 : index
    %c0_11 = arith.constant 0 : index
    %13 = vector.load %arg6[%c0_10, %c1, %c0_11] : memref<1x2x128xf32, #tpu.memory_space<vmem>>, vector<1x1x128xf32>
    %14 = vector.shape_cast %13 : vector<1x1x128xf32> to vector<1x128xf32>
    %15 = vector.shape_cast %12 : vector<1x128xf32> to vector<1x1x128xf32>
    tpu.vector_store %arg6[%c0_10, %c1, %c0_11], %15 {strides = array<i32>} : memref<1x2x128xf32, #tpu.memory_space<vmem>>, vector<1x1x128xf32>,
    return
  }
  func.func @transform_0(%arg0: i32, %arg1: i32, %arg2: i32) -> (i32, i32) {
    %c0_i32 = arith.constant 0 : i32
    return %arg0, %arg2 : i32, i32
  }
  func.func @transform_1(%arg0: i32, %arg1: i32, %arg2: i32) -> (i32, i32) {
    %c0_i32 = arith.constant 0 : i32
    return %arg2, %arg1 : i32, i32
  }
  func.func @transform_2(%arg0: i32, %arg1: i32, %arg2: i32) -> (i32, i32) {
    %c0_i32 = arith.constant 0 : i32
    return %arg0, %arg1 : i32, i32
  }
  func.func @transform_3(%arg0: i32, %arg1: i32, %arg2: i32) -> (i32, i32, i32) {
    %c0_i32 = arith.constant 0 : i32
    %c0_i32_0 = arith.constant 0 : i32
    return %arg0, %c0_i32, %arg1 : i32, i32, i32
  }
}

module attributes {stable_mosaic.version = 11 : i64} {
  func.func @_bn_act_kernel(%arg0: i32, %arg1: i32, %arg2: memref<128x128xbf16, #tpu.memory_space<vmem>>, %arg3: memref<1x128xf32, #tpu.memory_space<vmem>>, %arg4: memref<1x128xf32, #tpu.memory_space<vmem>>, %arg5: memref<128x128xbf16, #tpu.memory_space<vmem>>) attributes {dimension_semantics = [#tpu.dimension_semantics<parallel>, #tpu.dimension_semantics<parallel>], iteration_bounds = array<i64: 1, 1>, scalar_prefetch = 0 : i64, scratch_operands = 0 : i64, tpu.core_type = #tpu.core_type<tc>, window_params = [{transform_indices = @transform_0, window_bounds = array<i64: 128, 128>}, {transform_indices = @transform_1, window_bounds = array<i64: 1, 128>}, {transform_indices = @transform_2, window_bounds = array<i64: 1, 128>}, {transform_indices = @transform_3, window_bounds = array<i64: 128, 128>}]} {
    %c0 = arith.constant 0 : index
    %c0_0 = arith.constant 0 : index
    %0 = vector.load %arg2[%c0, %c0_0] : memref<128x128xbf16, #tpu.memory_space<vmem>>, vector<128x128xbf16>
    %1 = arith.extf %0 : vector<128x128xbf16> to vector<128x128xf32>
    %c0_1 = arith.constant 0 : index
    %c0_2 = arith.constant 0 : index
    %2 = vector.load %arg3[%c0_1, %c0_2] : memref<1x128xf32, #tpu.memory_space<vmem>>, vector<1x128xf32>
    %3 = vector.broadcast %2 : vector<1x128xf32> to vector<128x128xf32>
    %4 = arith.mulf %1, %3 : vector<128x128xf32>
    %c0_3 = arith.constant 0 : index
    %c0_4 = arith.constant 0 : index
    %5 = vector.load %arg4[%c0_3, %c0_4] : memref<1x128xf32, #tpu.memory_space<vmem>>, vector<1x128xf32>
    %6 = vector.broadcast %5 : vector<1x128xf32> to vector<128x128xf32>
    %7 = arith.addf %4, %6 : vector<128x128xf32>
    %cst = arith.constant 2.000000e-01 : f32
    %8 = vector.broadcast %cst : f32 to vector<128x128xf32>
    %9 = arith.mulf %8, %7 : vector<128x128xf32>
    %10 = arith.maximumf %7, %9 : vector<128x128xf32>
    %11 = arith.truncf %10 : vector<128x128xf32> to vector<128x128xbf16>
    %c0_5 = arith.constant 0 : index
    %c0_6 = arith.constant 0 : index
    %12 = vector.load %arg5[%c0_5, %c0_6] : memref<128x128xbf16, #tpu.memory_space<vmem>>, vector<128x128xbf16>
    tpu.vector_store %arg5[%c0_5, %c0_6], %11 {strides = array<i32>} : memref<128x128xbf16, #tpu.memory_space<vmem>>, vector<128x128xbf16>,
    return
  }
  func.func @transform_0(%arg0: i32, %arg1: i32) -> (i32, i32) {
    %c0_i32 = arith.constant 0 : i32
    return %arg0, %arg1 : i32, i32
  }
  func.func @transform_1(%arg0: i32, %arg1: i32) -> (i32, i32) {
    %c0_i32 = arith.constant 0 : i32
    %c0_i32_0 = arith.constant 0 : i32
    return %c0_i32, %arg1 : i32, i32
  }
  func.func @transform_2(%arg0: i32, %arg1: i32) -> (i32, i32) {
    %c0_i32 = arith.constant 0 : i32
    %c0_i32_0 = arith.constant 0 : i32
    return %c0_i32, %arg1 : i32, i32
  }
  func.func @transform_3(%arg0: i32, %arg1: i32) -> (i32, i32) {
    %c0_i32 = arith.constant 0 : i32
    return %arg0, %arg1 : i32, i32
  }
}

module attributes {stable_mosaic.version = 11 : i64} {
  func.func @_mm_single_kernel(%arg0: i32, %arg1: i32, %arg2: i32, %arg3: memref<8x1024xbf16, #tpu.memory_space<vmem>>, %arg4: memref<1024x128xbf16, #tpu.memory_space<vmem>>, %arg5: memref<8x128xf32, #tpu.memory_space<vmem>>) attributes {dimension_semantics = [#tpu.dimension_semantics<parallel>, #tpu.dimension_semantics<parallel>, #tpu.dimension_semantics<arbitrary>], iteration_bounds = array<i64: 1, 1, 1>, scalar_prefetch = 0 : i64, scratch_operands = 0 : i64, tpu.core_type = #tpu.core_type<tc>, window_params = [{transform_indices = @transform_0, window_bounds = array<i64: 8, 1024>}, {transform_indices = @transform_1, window_bounds = array<i64: 1024, 128>}, {transform_indices = @transform_2, window_bounds = array<i64: 8, 128>}]} {
    %c0 = arith.constant 0 : index
    %c0_0 = arith.constant 0 : index
    %0 = vector.load %arg3[%c0, %c0_0] : memref<8x1024xbf16, #tpu.memory_space<vmem>>, vector<8x1024xbf16>
    %c0_1 = arith.constant 0 : index
    %c0_2 = arith.constant 0 : index
    %1 = vector.load %arg4[%c0_1, %c0_2] : memref<1024x128xbf16, #tpu.memory_space<vmem>>, vector<1024x128xbf16>
    %cst = arith.constant dense<0.000000e+00> : vector<8x128xf32>
    %2 = tpu.matmul %0, %1, %cst {dimension_numbers = #tpu.dot_dimension_numbers<[1], [0], [0], [1], [0, 0, 1, 1], [], []>} : vector<8x1024xbf16>, vector<1024x128xbf16>, vector<8x128xf32> -> vector<8x128xf32>
    %c0_3 = arith.constant 0 : index
    %c0_4 = arith.constant 0 : index
    %3 = vector.load %arg5[%c0_3, %c0_4] : memref<8x128xf32, #tpu.memory_space<vmem>>, vector<8x128xf32>
    tpu.vector_store %arg5[%c0_3, %c0_4], %2 {strides = array<i32>} : memref<8x128xf32, #tpu.memory_space<vmem>>, vector<8x128xf32>,
    return
  }
  func.func @transform_0(%arg0: i32, %arg1: i32, %arg2: i32) -> (i32, i32) {
    %c0_i32 = arith.constant 0 : i32
    return %arg0, %arg2 : i32, i32
  }
  func.func @transform_1(%arg0: i32, %arg1: i32, %arg2: i32) -> (i32, i32) {
    %c0_i32 = arith.constant 0 : i32
    return %arg2, %arg1 : i32, i32
  }
  func.func @transform_2(%arg0: i32, %arg1: i32, %arg2: i32) -> (i32, i32) {
    %c0_i32 = arith.constant 0 : i32
    return %arg0, %arg1 : i32, i32
  }
}

</mosaic_0001>

<bundles_post_ra>
// kernel: net_d_forward.4
= control target key start
LH: loop header
LB: loop body
LE: loop exit
PB: predicated region body
PF: predicated region fallthrough
CT: control target
= control target key end

     0   :  { %s1839_s1 = inlined_call_operand.vmem [shape: bf16[128,128], index: 1, kind: input, shape index: {}]   ;;  %s1840_s0 = inlined_call_operand.vmem [shape: bf16[512,128], index: 0, kind: input, shape index: {}]   ;;  %s1841_s2 = inlined_call_operand.vmem [shape: bf16[512,128], index: 2, kind: output, shape index: {}]  }
   0x1   :  { %v1568_v0 = vld [vmem:[%s1839_s1] sm:$0xff]   ;;  %v1569_v1 = vld [vmem:[%s1839_s1 + $0x8] sm:$0xff]   ;;  %v1570_v2 = vld [vmem:[%s1839_s1 + $0x10] sm:$0xff]  }
   0x2   :  { %1472 = vmatprep.subr.bf16.mxu0 %v1568_v0  ;;  %1552 = vmatprep.subr.bf16.mxu1 %v1568_v0  ;;  %v1571_v3 = vld [vmem:[%s1839_s1 + $0x18] sm:$0xff]   ;;  %v1576_v4 = vld [vmem:[%s1840_s0] sm:$0xff]   ;;  %v1573_v7 = vld [vmem:[%s1839_s1 + $0x28] sm:$0xff]  }
   0x3   :  { %1473 = vmatpush3.bf16.msra.mxu0 %v1568_v0  ;;  %1560 = vmatpush3.bf16.msra.mxu1 %v1568_v0  ;;  %v1577_v5 = vld [vmem:[%s1840_s0 + $0x80] sm:$0xff]   ;;  %v1574_v8 = vld [vmem:[%s1839_s1 + $0x30] sm:$0xff]   ;;  %v1575_v9 = vld [vmem:[%s1839_s1 + $0x38] sm:$0xff]  }
   0x4   :  { %1474 = vmatprep.subr.bf16.mxu0 %v1569_v1  ;;  %1553 = vmatprep.subr.bf16.mxu1 %v1569_v1  ;;  %v1572_v6 = vld [vmem:[%s1839_s1 + $0x20] sm:$0xff]   ;;  %v1578_v10 = vld [vmem:[%s1840_s0 + $0x8] sm:$0xff]   ;;  %v1580_v12 = vld [vmem:[%s1840_s0 + $0x10] sm:$0xff]  }
   0x5   :  { %1488 = vmatprep.mubr.bf16.mxu0 %v1576_v4  ;;  %1520 = vmatprep.mubr.bf16.mxu1 %v1577_v5  ;;  %v1579_v11 = vld [vmem:[%s1840_s0 + $0x88] sm:$0xff]   ;;  %v1581_v13 = vld [vmem:[%s1840_s0 + $0x90] sm:$0xff]   ;;  %v1582_v14 = vld [vmem:[%s1840_s0 + $0x18] sm:$0xff]  }
   0x6   :  { %v1583_v15 = vld [vmem:[%s1840_s0 + $0x98] sm:$0xff]   ;;  %v1584_v16 = vld [vmem:[%s1840_s0 + $0x20] sm:$0xff]   ;;  %v1586_v18 = vld [vmem:[%s1840_s0 + $0x28] sm:$0xff]  }
   0x7   :  { %1475 = vmatpush3.bf16.msra.mxu0 %v1569_v1  ;;  %1561 = vmatpush3.bf16.msra.mxu1 %v1569_v1  ;;  %v1585_v17 = vld [vmem:[%s1840_s0 + $0xa0] sm:$0xff]   ;;  %v1587_v19 = vld [vmem:[%s1840_s0 + $0xa8] sm:$0xff]   ;;  %v1588_v20 = vld [vmem:[%s1840_s0 + $0x30] sm:$0xff]  }
   0x8   :  { %1476 = vmatprep.subr.bf16.mxu0 %v1570_v2  ;;  %1554 = vmatprep.subr.bf16.mxu1 %v1570_v2  ;;  %v1589_v21 = vld [vmem:[%s1840_s0 + $0xb0] sm:$0xff]   ;;  %v1590_v22 = vld [vmem:[%s1840_s0 + $0x38] sm:$0xff]   ;;  %v1592_v24 = vld [vmem:[%s1840_s0 + $0x40] sm:$0xff]  }
   0x9   :  { %v1591_v23 = vld [vmem:[%s1840_s0 + $0xb8] sm:$0xff]   ;;  %v1593_v25 = vld [vmem:[%s1840_s0 + $0xc0] sm:$0xff]   ;;  %v1594_v26 = vld [vmem:[%s1840_s0 + $0x48] sm:$0xff]  }
   0xa   :  { %v1595_v27 = vld [vmem:[%s1840_s0 + $0xc8] sm:$0xff]   ;;  %v1596_v28 = vld [vmem:[%s1840_s0 + $0x50] sm:$0xff]   ;;  %v1598_v30 = vld [vmem:[%s1840_s0 + $0x58] sm:$0xff]  }
   0xb   :  { %1477 = vmatpush3.bf16.msra.mxu0 %v1570_v2  ;;  %1562 = vmatpush3.bf16.msra.mxu1 %v1570_v2  ;;  %v1597_v29 = vld [vmem:[%s1840_s0 + $0xd0] sm:$0xff]   ;;  %v1599_v31 = vld [vmem:[%s1840_s0 + $0xd8] sm:$0xff]   ;;  %v1600_v32 = vld [vmem:[%s1840_s0 + $0x60] sm:$0xff]  }
   0xc   :  { %1478 = vmatprep.subr.bf16.mxu0 %v1571_v3  ;;  %1555 = vmatprep.subr.bf16.mxu1 %v1571_v3  ;;  %v1601_v33 = vld [vmem:[%s1840_s0 + $0xe0] sm:$0xff]   ;;  %v1602_v34 = vld [vmem:[%s1840_s0 + $0x68] sm:$0xff]   ;;  %v1604_v36 = vld [vmem:[%s1840_s0 + $0x70] sm:$0xff]  }
   0xd   :  { %v1603_v35 = vld [vmem:[%s1840_s0 + $0xe8] sm:$0xff]   ;;  %v1605_v37 = vld [vmem:[%s1840_s0 + $0xf0] sm:$0xff]   ;;  %v1606_v38 = vld [vmem:[%s1840_s0 + $0x78] sm:$0xff]  }
   0xe   :  { %v1607_v39 = vld [vmem:[%s1840_s0 + $0xf8] sm:$0xff]  }
   0xf   :  { %1479 = vmatpush3.bf16.msra.mxu0 %v1571_v3  ;;  %1563 = vmatpush3.bf16.msra.mxu1 %v1571_v3 }
  0x10   :  { %1480 = vmatprep.subr.bf16.mxu0 %v1572_v6  ;;  %1556 = vmatprep.subr.bf16.mxu1 %v1572_v6 }
  0x13   :  { %1481 = vmatpush3.bf16.msra.mxu0 %v1572_v6  ;;  %1564 = vmatpush3.bf16.msra.mxu1 %v1572_v6 }
  0x14   :  { %1482 = vmatprep.subr.bf16.mxu0 %v1573_v7  ;;  %1557 = vmatprep.subr.bf16.mxu1 %v1573_v7 }
  0x17   :  { %1483 = vmatpush3.bf16.msra.mxu0 %v1573_v7  ;;  %1565 = vmatpush3.bf16.msra.mxu1 %v1573_v7 }
  0x18   :  { %1484 = vmatprep.subr.bf16.mxu0 %v1574_v8  ;;  %1558 = vmatprep.subr.bf16.mxu1 %v1574_v8 }
  0x1b   :  { %1485 = vmatpush3.bf16.msra.mxu0 %v1574_v8  ;;  %1566 = vmatpush3.bf16.msra.mxu1 %v1574_v8 }
  0x1c   :  { %1486 = vmatprep.subr.bf16.mxu0 %v1575_v9  ;;  %1559 = vmatprep.subr.bf16.mxu1 %v1575_v9 }
  0x1f   :  { %1487 = vmatpush3.bf16.msra.mxu0 %v1575_v9  ;;  %1567 = vmatpush3.bf16.msra.mxu1 %v1575_v9 }
  0x22   :  { %1489 = vmatmul.mubr.bf16.vlgmr.msra.gmra.mrb[0].mxu0 %v1578_v10  ;;  %1521 = vmatmul.mubr.bf16.vlgmr.msra.gmra.mrb[0].mxu1 %v1579_v11 }
  0x23   :  { %1492 = vmatprep.mubr.bf16.mxu0 %v1580_v12  ;;  %1524 = vmatprep.mubr.bf16.mxu1 %v1581_v13 }
  0x2a   :  { %1493 = vmatmul.mubr.bf16.gmra.mrb[4].mxu0 %v1582_v14  ;;  %1525 = vmatmul.mubr.bf16.gmra.mrb[4].mxu1 %v1583_v15 }
  0x2b   :  { %1496 = vmatprep.mubr.bf16.mxu0 %v1584_v16  ;;  %1528 = vmatprep.mubr.bf16.mxu1 %v1585_v17 }
  0x32   :  { %1497 = vmatmul.mubr.bf16.gmra.mrb[8].mxu0 %v1586_v18  ;;  %1529 = vmatmul.mubr.bf16.gmra.mrb[8].mxu1 %v1587_v19 }
  0x33   :  { %1500 = vmatprep.mubr.bf16.mxu0 %v1588_v20  ;;  %1532 = vmatprep.mubr.bf16.mxu1 %v1589_v21 }
  0x3a   :  { %1501 = vmatmul.mubr.bf16.gmra.mrb[12].mxu0 %v1590_v22  ;;  %1533 = vmatmul.mubr.bf16.gmra.mrb[12].mxu1 %v1591_v23 }
  0x3b   :  { %1504 = vmatprep.mubr.bf16.mxu0 %v1592_v24  ;;  %1536 = vmatprep.mubr.bf16.mxu1 %v1593_v25 }
  0x42   :  { %1505 = vmatmul.mubr.bf16.gmra.mrb[16].mxu0 %v1594_v26  ;;  %1537 = vmatmul.mubr.bf16.gmra.mrb[16].mxu1 %v1595_v27 }
  0x43   :  { %1508 = vmatprep.mubr.bf16.mxu0 %v1596_v28  ;;  %1540 = vmatprep.mubr.bf16.mxu1 %v1597_v29 }
  0x4a   :  { %1509 = vmatmul.mubr.bf16.gmra.mrb[20].mxu0 %v1598_v30  ;;  %1541 = vmatmul.mubr.bf16.gmra.mrb[20].mxu1 %v1599_v31 }
  0x4b   :  { %1512 = vmatprep.mubr.bf16.mxu0 %v1600_v32  ;;  %1544 = vmatprep.mubr.bf16.mxu1 %v1601_v33 }
  0x52   :  { %1513 = vmatmul.mubr.bf16.gmra.mrb[24].mxu0 %v1602_v34  ;;  %1545 = vmatmul.mubr.bf16.gmra.mrb[24].mxu1 %v1603_v35 }
  0x53   :  { %1516 = vmatprep.mubr.bf16.mxu0 %v1604_v36  ;;  %1548 = vmatprep.mubr.bf16.mxu1 %v1605_v37 }
  0x5a   :  { %1517 = vmatmul.mubr.bf16.gmra.mrb[28].mxu0 %v1606_v38  ;;  %1549 = vmatmul.mubr.bf16.gmra.mrb[28].mxu1 %v1607_v39 }
  0xf5   :  { %v1490_v40 = vpop.f32.mrb[0].mxu0  ;;  %v1522_v41 = vpop.f32.mrb[0].mxu1 }
  0xf6   :  { %v623_v42 = vmul.f32 0.2, %v1490_v40  ;;  %v655_v43 = vmul.f32 0.2, %v1522_v41  ;;  %v366_v44 = vpop.f32.mrb[1].mxu0  ;;  %v494_v45 = vpop.f32.mrb[1].mxu1 }
  0xf7   :  { %v621_v46 = vmul.f32 0.2, %v366_v44  ;;  %v653_v47 = vmul.f32 0.2, %v494_v45  ;;  %v1491_v48 = vpop.f32.mrb[2].mxu0  ;;  %v1523_v49 = vpop.f32.mrb[2].mxu1 }
  0xf8   :  { %v624_v50 = vmul.f32 0.2, %v1491_v48  ;;  %v656_v51 = vmul.f32 0.2, %v1523_v49  ;;  %v369_v52 = vpop.f32.mrb[3].mxu0  ;;  %v497_v53 = vpop.f32.mrb[3].mxu1  ;;  %v687_v56 = vmax.f32 %v1490_v40, %v623_v42  ;;  %v719_v57 = vmax.f32 %v1522_v41, %v655_v43 }
  0xf9   :  { %v622_v54 = vmul.f32 0.2, %v369_v52  ;;  %v654_v55 = vmul.f32 0.2, %v497_v53  ;;  %v685_v60 = vmax.f32 %v366_v44, %v621_v46  ;;  %v717_v61 = vmax.f32 %v494_v45, %v653_v47 }
  0xfa   :  { %v688_v58 = vmax.f32 %v1491_v48, %v624_v50  ;;  %v720_v59 = vmax.f32 %v1523_v49, %v656_v51 }
  0xfb   :  { %v686_v62 = vmax.f32 %v369_v52, %v622_v54  ;;  %v718_v63 = vmax.f32 %v497_v53, %v654_v55 }
  0xfc   :  { %v1249_v0 = vpack.c.bf16 %v688_v58, %v687_v56  ;;  %v1329_v1 = vpack.c.bf16 %v720_v59, %v719_v57 }
  0xfd   :  { %v1244_v2 = vpack.c.bf16 %v686_v62, %v685_v60  ;;  %v1324_v3 = vpack.c.bf16 %v718_v63, %v717_v61  ;;  %v1494_v4 = vpop.f32.mrb[4].mxu0  ;;  %v1526_v5 = vpop.f32.mrb[4].mxu1 }
  0xfe   :  { %1401 = vst [vmem:[%s1841_s2 + $0x8] sm:$0xff] %v1249_v0   ;;  %1417 = vst [vmem:[%s1841_s2 + $0x88] sm:$0xff] %v1329_v1   ;;  %v627_v6 = vmul.f32 0.2, %v1494_v4  ;;  %v659_v7 = vmul.f32 0.2, %v1526_v5 }
  0xff   :  { %v382_v8 = vpop.f32.mrb[5].mxu0  ;;  %v510_v9 = vpop.f32.mrb[5].mxu1  ;;  %1245 = vst [vmem:[%s1841_s2] sm:$0xff] %v1244_v2   ;;  %1416 = vst [vmem:[%s1841_s2 + $0x80] sm:$0xff] %v1324_v3  }
 0x100   :  { %v625_v10 = vmul.f32 0.2, %v382_v8  ;;  %v657_v11 = vmul.f32 0.2, %v510_v9  ;;  %v1495_v12 = vpop.f32.mrb[6].mxu0  ;;  %v1527_v13 = vpop.f32.mrb[6].mxu1  ;;  %v691_v20 = vmax.f32 %v1494_v4, %v627_v6  ;;  %v723_v21 = vmax.f32 %v1526_v5, %v659_v7 }
 0x101   :  { %v628_v14 = vmul.f32 0.2, %v1495_v12  ;;  %v660_v15 = vmul.f32 0.2, %v1527_v13  ;;  %v385_v16 = vpop.f32.mrb[7].mxu0  ;;  %v513_v17 = vpop.f32.mrb[7].mxu1 }
 0x102   :  { %v626_v18 = vmul.f32 0.2, %v385_v16  ;;  %v658_v19 = vmul.f32 0.2, %v513_v17  ;;  %v689_v24 = vmax.f32 %v382_v8, %v625_v10  ;;  %v721_v25 = vmax.f32 %v510_v9, %v657_v11 }
 0x103   :  { %v692_v22 = vmax.f32 %v1495_v12, %v628_v14  ;;  %v724_v23 = vmax.f32 %v1527_v13, %v660_v15 }
 0x104   :  { %v690_v26 = vmax.f32 %v385_v16, %v626_v18  ;;  %v722_v27 = vmax.f32 %v513_v17, %v658_v19 }
 0x105   :  { %v1259_v28 = vpack.c.bf16 %v692_v22, %v691_v20  ;;  %v1339_v29 = vpack.c.bf16 %v724_v23, %v723_v21  ;;  %v1498_v32 = vpop.f32.mrb[8].mxu0  ;;  %v1530_v33 = vpop.f32.mrb[8].mxu1 }
 0x106   :  { %v1254_v30 = vpack.c.bf16 %v690_v26, %v689_v24  ;;  %v1334_v31 = vpack.c.bf16 %v722_v27, %v721_v25  ;;  %v631_v34 = vmul.f32 0.2, %v1498_v32  ;;  %v663_v35 = vmul.f32 0.2, %v1530_v33  ;;  %v398_v36 = vpop.f32.mrb[9].mxu0  ;;  %v526_v37 = vpop.f32.mrb[9].mxu1 }
 0x107   :  { %1403 = vst [vmem:[%s1841_s2 + $0x18] sm:$0xff] %v1259_v28   ;;  %1419 = vst [vmem:[%s1841_s2 + $0x98] sm:$0xff] %v1339_v29   ;;  %v629_v38 = vmul.f32 0.2, %v398_v36  ;;  %v661_v39 = vmul.f32 0.2, %v526_v37 }
 0x108   :  { %1402 = vst [vmem:[%s1841_s2 + $0x10] sm:$0xff] %v1254_v30   ;;  %1418 = vst [vmem:[%s1841_s2 + $0x90] sm:$0xff] %v1334_v31   ;;  %v1499_v40 = vpop.f32.mrb[10].mxu0  ;;  %v1531_v41 = vpop.f32.mrb[10].mxu1  ;;  %v695_v48 = vmax.f32 %v1498_v32, %v631_v34  ;;  %v727_v49 = vmax.f32 %v1530_v33, %v663_v35 }
 0x109   :  { %v632_v42 = vmul.f32 0.2, %v1499_v40  ;;  %v664_v43 = vmul.f32 0.2, %v1531_v41  ;;  %v401_v44 = vpop.f32.mrb[11].mxu0  ;;  %v529_v45 = vpop.f32.mrb[11].mxu1  ;;  %v693_v52 = vmax.f32 %v398_v36, %v629_v38  ;;  %v725_v53 = vmax.f32 %v526_v37, %v661_v39 }
 0x10a   :  { %v630_v46 = vmul.f32 0.2, %v401_v44  ;;  %v662_v47 = vmul.f32 0.2, %v529_v45 }
 0x10b   :  { %v696_v50 = vmax.f32 %v1499_v40, %v632_v42  ;;  %v728_v51 = vmax.f32 %v1531_v41, %v664_v43 }
 0x10c   :  { %v694_v54 = vmax.f32 %v401_v44, %v630_v46  ;;  %v726_v55 = vmax.f32 %v529_v45, %v662_v47 }
 0x10d   :  { %v1269_v56 = vpack.c.bf16 %v696_v50, %v695_v48  ;;  %v1349_v57 = vpack.c.bf16 %v728_v51, %v727_v49  ;;  %v1502_v60 = vpop.f32.mrb[12].mxu0  ;;  %v1534_v61 = vpop.f32.mrb[12].mxu1 }
 0x10e   :  { %v1264_v58 = vpack.c.bf16 %v694_v54, %v693_v52  ;;  %v1344_v59 = vpack.c.bf16 %v726_v55, %v725_v53  ;;  %v635_v62 = vmul.f32 0.2, %v1502_v60  ;;  %v667_v63 = vmul.f32 0.2, %v1534_v61  ;;  %v414_v0 = vpop.f32.mrb[13].mxu0  ;;  %v542_v1 = vpop.f32.mrb[13].mxu1 }
 0x10f   :  { %1405 = vst [vmem:[%s1841_s2 + $0x28] sm:$0xff] %v1269_v56   ;;  %1421 = vst [vmem:[%s1841_s2 + $0xa8] sm:$0xff] %v1349_v57   ;;  %v633_v2 = vmul.f32 0.2, %v414_v0  ;;  %v665_v3 = vmul.f32 0.2, %v542_v1 }
 0x110   :  { %1404 = vst [vmem:[%s1841_s2 + $0x20] sm:$0xff] %v1264_v58   ;;  %1420 = vst [vmem:[%s1841_s2 + $0xa0] sm:$0xff] %v1344_v59   ;;  %v1503_v4 = vpop.f32.mrb[14].mxu0  ;;  %v1535_v5 = vpop.f32.mrb[14].mxu1  ;;  %v699_v12 = vmax.f32 %v1502_v60, %v635_v62  ;;  %v731_v13 = vmax.f32 %v1534_v61, %v667_v63 }
 0x111   :  { %v636_v6 = vmul.f32 0.2, %v1503_v4  ;;  %v668_v7 = vmul.f32 0.2, %v1535_v5  ;;  %v417_v8 = vpop.f32.mrb[15].mxu0  ;;  %v545_v9 = vpop.f32.mrb[15].mxu1  ;;  %v697_v16 = vmax.f32 %v414_v0, %v633_v2  ;;  %v729_v17 = vmax.f32 %v542_v1, %v665_v3 }
 0x112   :  { %v634_v10 = vmul.f32 0.2, %v417_v8  ;;  %v666_v11 = vmul.f32 0.2, %v545_v9 }
 0x113   :  { %v700_v14 = vmax.f32 %v1503_v4, %v636_v6  ;;  %v732_v15 = vmax.f32 %v1535_v5, %v668_v7 }
 0x114   :  { %v698_v18 = vmax.f32 %v417_v8, %v634_v10  ;;  %v730_v19 = vmax.f32 %v545_v9, %v666_v11 }
 0x115   :  { %v1279_v20 = vpack.c.bf16 %v700_v14, %v699_v12  ;;  %v1359_v21 = vpack.c.bf16 %v732_v15, %v731_v13  ;;  %v1506_v24 = vpop.f32.mrb[16].mxu0  ;;  %v1538_v25 = vpop.f32.mrb[16].mxu1 }
 0x116   :  { %v1274_v22 = vpack.c.bf16 %v698_v18, %v697_v16  ;;  %v1354_v23 = vpack.c.bf16 %v730_v19, %v729_v17  ;;  %v639_v26 = vmul.f32 0.2, %v1506_v24  ;;  %v671_v27 = vmul.f32 0.2, %v1538_v25  ;;  %v430_v28 = vpop.f32.mrb[17].mxu0  ;;  %v558_v29 = vpop.f32.mrb[17].mxu1 }
 0x117   :  { %1407 = vst [vmem:[%s1841_s2 + $0x38] sm:$0xff] %v1279_v20   ;;  %1423 = vst [vmem:[%s1841_s2 + $0xb8] sm:$0xff] %v1359_v21   ;;  %v637_v30 = vmul.f32 0.2, %v430_v28  ;;  %v669_v31 = vmul.f32 0.2, %v558_v29 }
 0x118   :  { %1406 = vst [vmem:[%s1841_s2 + $0x30] sm:$0xff] %v1274_v22   ;;  %1422 = vst [vmem:[%s1841_s2 + $0xb0] sm:$0xff] %v1354_v23   ;;  %v1507_v32 = vpop.f32.mrb[18].mxu0  ;;  %v1539_v33 = vpop.f32.mrb[18].mxu1  ;;  %v703_v40 = vmax.f32 %v1506_v24, %v639_v26  ;;  %v735_v41 = vmax.f32 %v1538_v25, %v671_v27 }
 0x119   :  { %v640_v34 = vmul.f32 0.2, %v1507_v32  ;;  %v672_v35 = vmul.f32 0.2, %v1539_v33  ;;  %v433_v36 = vpop.f32.mrb[19].mxu0  ;;  %v561_v37 = vpop.f32.mrb[19].mxu1  ;;  %v701_v44 = vmax.f32 %v430_v28, %v637_v30  ;;  %v733_v45 = vmax.f32 %v558_v29, %v669_v31 }
 0x11a   :  { %v638_v38 = vmul.f32 0.2, %v433_v36  ;;  %v670_v39 = vmul.f32 0.2, %v561_v37 }
 0x11b   :  { %v704_v42 = vmax.f32 %v1507_v32, %v640_v34  ;;  %v736_v43 = vmax.f32 %v1539_v33, %v672_v35 }
 0x11c   :  { %v702_v46 = vmax.f32 %v433_v36, %v638_v38  ;;  %v734_v47 = vmax.f32 %v561_v37, %v670_v39 }
 0x11d   :  { %v1289_v48 = vpack.c.bf16 %v704_v42, %v703_v40  ;;  %v1369_v49 = vpack.c.bf16 %v736_v43, %v735_v41  ;;  %v1510_v52 = vpop.f32.mrb[20].mxu0  ;;  %v1542_v53 = vpop.f32.mrb[20].mxu1 }
 0x11e   :  { %v1284_v50 = vpack.c.bf16 %v702_v46, %v701_v44  ;;  %v1364_v51 = vpack.c.bf16 %v734_v47, %v733_v45  ;;  %v643_v54 = vmul.f32 0.2, %v1510_v52  ;;  %v675_v55 = vmul.f32 0.2, %v1542_v53  ;;  %v446_v56 = vpop.f32.mrb[21].mxu0  ;;  %v574_v57 = vpop.f32.mrb[21].mxu1 }
 0x11f   :  { %1409 = vst [vmem:[%s1841_s2 + $0x48] sm:$0xff] %v1289_v48   ;;  %1425 = vst [vmem:[%s1841_s2 + $0xc8] sm:$0xff] %v1369_v49   ;;  %v641_v58 = vmul.f32 0.2, %v446_v56  ;;  %v673_v59 = vmul.f32 0.2, %v574_v57 }
 0x120   :  { %1408 = vst [vmem:[%s1841_s2 + $0x40] sm:$0xff] %v1284_v50   ;;  %1424 = vst [vmem:[%s1841_s2 + $0xc0] sm:$0xff] %v1364_v51   ;;  %v1511_v60 = vpop.f32.mrb[22].mxu0  ;;  %v1543_v61 = vpop.f32.mrb[22].mxu1  ;;  %v707_v4 = vmax.f32 %v1510_v52, %v643_v54  ;;  %v739_v5 = vmax.f32 %v1542_v53, %v675_v55 }
 0x121   :  { %v644_v62 = vmul.f32 0.2, %v1511_v60  ;;  %v676_v63 = vmul.f32 0.2, %v1543_v61  ;;  %v449_v0 = vpop.f32.mrb[23].mxu0  ;;  %v577_v1 = vpop.f32.mrb[23].mxu1  ;;  %v705_v8 = vmax.f32 %v446_v56, %v641_v58  ;;  %v737_v9 = vmax.f32 %v574_v57, %v673_v59 }
 0x122   :  { %v642_v2 = vmul.f32 0.2, %v449_v0  ;;  %v674_v3 = vmul.f32 0.2, %v577_v1 }
 0x123   :  { %v708_v6 = vmax.f32 %v1511_v60, %v644_v62  ;;  %v740_v7 = vmax.f32 %v1543_v61, %v676_v63 }
 0x124   :  { %v706_v10 = vmax.f32 %v449_v0, %v642_v2  ;;  %v738_v11 = vmax.f32 %v577_v1, %v674_v3 }
 0x125   :  { %v1299_v12 = vpack.c.bf16 %v708_v6, %v707_v4  ;;  %v1379_v13 = vpack.c.bf16 %v740_v7, %v739_v5  ;;  %v1514_v16 = vpop.f32.mrb[24].mxu0  ;;  %v1546_v17 = vpop.f32.mrb[24].mxu1 }
 0x126   :  { %v1294_v14 = vpack.c.bf16 %v706_v10, %v705_v8  ;;  %v1374_v15 = vpack.c.bf16 %v738_v11, %v737_v9  ;;  %v647_v18 = vmul.f32 0.2, %v1514_v16  ;;  %v679_v19 = vmul.f32 0.2, %v1546_v17  ;;  %v462_v20 = vpop.f32.mrb[25].mxu0  ;;  %v590_v21 = vpop.f32.mrb[25].mxu1 }
 0x127   :  { %1411 = vst [vmem:[%s1841_s2 + $0x58] sm:$0xff] %v1299_v12   ;;  %1427 = vst [vmem:[%s1841_s2 + $0xd8] sm:$0xff] %v1379_v13   ;;  %v645_v22 = vmul.f32 0.2, %v462_v20  ;;  %v677_v23 = vmul.f32 0.2, %v590_v21 }
 0x128   :  { %1410 = vst [vmem:[%s1841_s2 + $0x50] sm:$0xff] %v1294_v14   ;;  %1426 = vst [vmem:[%s1841_s2 + $0xd0] sm:$0xff] %v1374_v15   ;;  %v1515_v24 = vpop.f32.mrb[26].mxu0  ;;  %v1547_v25 = vpop.f32.mrb[26].mxu1  ;;  %v711_v32 = vmax.f32 %v1514_v16, %v647_v18  ;;  %v743_v33 = vmax.f32 %v1546_v17, %v679_v19 }
 0x129   :  { %v648_v26 = vmul.f32 0.2, %v1515_v24  ;;  %v680_v27 = vmul.f32 0.2, %v1547_v25  ;;  %v465_v28 = vpop.f32.mrb[27].mxu0  ;;  %v593_v29 = vpop.f32.mrb[27].mxu1  ;;  %v709_v36 = vmax.f32 %v462_v20, %v645_v22  ;;  %v741_v37 = vmax.f32 %v590_v21, %v677_v23 }
 0x12a   :  { %v646_v30 = vmul.f32 0.2, %v465_v28  ;;  %v678_v31 = vmul.f32 0.2, %v593_v29 }
 0x12b   :  { %v712_v34 = vmax.f32 %v1515_v24, %v648_v26  ;;  %v744_v35 = vmax.f32 %v1547_v25, %v680_v27 }
 0x12c   :  { %v710_v38 = vmax.f32 %v465_v28, %v646_v30  ;;  %v742_v39 = vmax.f32 %v593_v29, %v678_v31 }
 0x12d   :  { %v1309_v40 = vpack.c.bf16 %v712_v34, %v711_v32  ;;  %v1389_v41 = vpack.c.bf16 %v744_v35, %v743_v33  ;;  %v1518_v44 = vpop.f32.mrb[28].mxu0  ;;  %v1550_v45 = vpop.f32.mrb[28].mxu1 }
 0x12e   :  { %v1304_v42 = vpack.c.bf16 %v710_v38, %v709_v36  ;;  %v1384_v43 = vpack.c.bf16 %v742_v39, %v741_v37  ;;  %v651_v46 = vmul.f32 0.2, %v1518_v44  ;;  %v683_v47 = vmul.f32 0.2, %v1550_v45  ;;  %v478_v48 = vpop.f32.mrb[29].mxu0  ;;  %v606_v49 = vpop.f32.mrb[29].mxu1 }
 0x12f   :  { %1413 = vst [vmem:[%s1841_s2 + $0x68] sm:$0xff] %v1309_v40   ;;  %1429 = vst [vmem:[%s1841_s2 + $0xe8] sm:$0xff] %v1389_v41   ;;  %v649_v50 = vmul.f32 0.2, %v478_v48  ;;  %v681_v51 = vmul.f32 0.2, %v606_v49 }
 0x130   :  { %1412 = vst [vmem:[%s1841_s2 + $0x60] sm:$0xff] %v1304_v42   ;;  %1428 = vst [vmem:[%s1841_s2 + $0xe0] sm:$0xff] %v1384_v43   ;;  %v1519_v52 = vpop.f32.mrb[30].mxu0  ;;  %v1551_v53 = vpop.f32.mrb[30].mxu1  ;;  %v715_v60 = vmax.f32 %v1518_v44, %v651_v46  ;;  %v747_v61 = vmax.f32 %v1550_v45, %v683_v47 }
 0x131   :  { %v652_v54 = vmul.f32 0.2, %v1519_v52  ;;  %v684_v55 = vmul.f32 0.2, %v1551_v53  ;;  %v481_v56 = vpop.f32.mrb[31].mxu0  ;;  %v609_v57 = vpop.f32.mrb[31].mxu1  ;;  %v713_v0 = vmax.f32 %v478_v48, %v649_v50  ;;  %v745_v1 = vmax.f32 %v606_v49, %v681_v51 }
 0x132   :  { %v650_v58 = vmul.f32 0.2, %v481_v56  ;;  %v682_v59 = vmul.f32 0.2, %v609_v57 }
 0x133   :  { %v716_v62 = vmax.f32 %v1519_v52, %v652_v54  ;;  %v748_v63 = vmax.f32 %v1551_v53, %v684_v55 }
 0x134   :  { %v714_v2 = vmax.f32 %v481_v56, %v650_v58  ;;  %v746_v3 = vmax.f32 %v609_v57, %v682_v59 }
 0x135   :  { %v1319_v4 = vpack.c.bf16 %v716_v62, %v715_v60  ;;  %v1399_v5 = vpack.c.bf16 %v748_v63, %v747_v61 }
 0x136   :  { %v1314_v6 = vpack.c.bf16 %v714_v2, %v713_v0  ;;  %v1394_v7 = vpack.c.bf16 %v746_v3, %v745_v1 }
 0x137   :  { %1415 = vst [vmem:[%s1841_s2 + $0x78] sm:$0xff] %v1319_v4   ;;  %1431 = vst [vmem:[%s1841_s2 + $0xf8] sm:$0xff] %v1399_v5  }
 0x138   :  { %1414 = vst [vmem:[%s1841_s2 + $0x70] sm:$0xff] %v1314_v6   ;;  %1430 = vst [vmem:[%s1841_s2 + $0xf0] sm:$0xff] %v1394_v7  }

// kernel: net_d_forward.6
= control target key start
LH: loop header
LB: loop body
LE: loop exit
PB: predicated region body
PF: predicated region fallthrough
CT: control target
= control target key end

     0   :  { %s438_s0 = inlined_call_operand.vmem [shape: bf16[128,128], index: 0, kind: input, shape index: {}]   ;;  %s439_s1 = inlined_call_operand.vmem [shape: f32[1,128], index: 1, kind: input, shape index: {}]   ;;  %s440_s2 = inlined_call_operand.vmem [shape: f32[1,128], index: 2, kind: input, shape index: {}]   ;;  %s441_s3 = inlined_call_operand.vmem [shape: bf16[128,128], index: 3, kind: output, shape index: {}]  }
   0x1   :  { %v243_v0 = vld [vmem:[%s438_s0] sm:$0xff]   ;;  %v314_v4 = vld [vmem:[%s438_s0 + $0x8] sm:$0xff]   ;;  %v315_v5 = vld [vmem:[%s438_s0 + $0x10] sm:$0xff]  }
   0x2   :  { %v354_v1 = vld [vmem:[%s439_s1] ss:$0 sm:$0xff]  ;;  %v244_v2 = vunpack.c.l.bf16 %v243_v0  ;;  %v245_v3 = vunpack.c.h.bf16 %v243_v0  ;;  %v316_v6 = vld [vmem:[%s438_s0 + $0x18] sm:$0xff]   ;;  %v248_v8 = vunpack.c.l.bf16 %v314_v4  ;;  %v249_v9 = vunpack.c.h.bf16 %v314_v4  ;;  %v318_v41 = vld [vmem:[%s438_s0 + $0x28] sm:$0xff]  }
   0x3   :  { %v368_v7 = vld [vmem:[%s440_s2] ss:$0 sm:$0xff]  ;;  %v252_v10 = vunpack.c.l.bf16 %v315_v5  ;;  %v253_v11 = vunpack.c.h.bf16 %v315_v5  ;;  %v256_v14 = vunpack.c.l.bf16 %v316_v6  ;;  %v257_v15 = vunpack.c.h.bf16 %v316_v6  ;;  %v319_v46 = vld [vmem:[%s438_s0 + $0x30] sm:$0xff]   ;;  %v320_v55 = vld [vmem:[%s438_s0 + $0x38] sm:$0xff]  }
   0x4   :  { %v53_v12 = vmul.f32 %v244_v2, %v354_v1  ;;  %v54_v13 = vmul.f32 %v245_v3, %v354_v1  ;;  %v55_v16 = vmul.f32 %v248_v8, %v354_v1  ;;  %v56_v17 = vmul.f32 %v249_v9, %v354_v1  ;;  %v317_v24 = vld [vmem:[%s438_s0 + $0x20] sm:$0xff]  }
   0x5   :  { %v57_v18 = vmul.f32 %v252_v10, %v354_v1  ;;  %v58_v19 = vmul.f32 %v253_v11, %v354_v1  ;;  %v59_v22 = vmul.f32 %v256_v14, %v354_v1  ;;  %v60_v23 = vmul.f32 %v257_v15, %v354_v1 }
   0x6   :  { %v76_v20 = vadd.f32 %v368_v7, %v53_v12  ;;  %v77_v21 = vadd.f32 %v368_v7, %v54_v13  ;;  %v78_v25 = vadd.f32 %v368_v7, %v55_v16  ;;  %v79_v26 = vadd.f32 %v368_v7, %v56_v17 }
   0x7   :  { %v80_v27 = vadd.f32 %v368_v7, %v57_v18  ;;  %v81_v28 = vadd.f32 %v368_v7, %v58_v19  ;;  %v82_v31 = vadd.f32 %v368_v7, %v59_v22  ;;  %v83_v32 = vadd.f32 %v368_v7, %v60_v23 }
   0x8   :  { %v92_v29 = vmul.f32 0.2, %v76_v20  ;;  %v93_v30 = vmul.f32 0.2, %v77_v21  ;;  %v94_v33 = vmul.f32 0.2, %v78_v25  ;;  %v260_v36 = vunpack.c.l.bf16 %v317_v24 }
   0x9   :  { %v95_v34 = vmul.f32 0.2, %v79_v26  ;;  %v96_v35 = vmul.f32 0.2, %v80_v27  ;;  %v97_v39 = vmul.f32 0.2, %v81_v28  ;;  %v261_v50 = vunpack.c.h.bf16 %v317_v24 }
   0xa   :  { %v108_v37 = vmax.f32 %v76_v20, %v92_v29  ;;  %v109_v38 = vmax.f32 %v77_v21, %v93_v30  ;;  %v98_v40 = vmul.f32 0.2, %v82_v31  ;;  %v110_v42 = vmax.f32 %v78_v25, %v94_v33 }
   0xb   :  { %v111_v43 = vmax.f32 %v79_v26, %v95_v34  ;;  %v112_v44 = vmax.f32 %v80_v27, %v96_v35  ;;  %v99_v45 = vmul.f32 0.2, %v83_v32  ;;  %v113_v48 = vmax.f32 %v81_v28, %v97_v39 }
   0xc   :  { %v277_v47 = vpack.c.bf16 %v109_v38, %v108_v37  ;;  %v114_v49 = vmax.f32 %v82_v31, %v98_v40  ;;  %v61_v53 = vmul.f32 %v260_v36, %v354_v1  ;;  %v264_v54 = vunpack.c.l.bf16 %v318_v41 }
   0xd   :  { %v282_v51 = vpack.c.bf16 %v111_v43, %v110_v42  ;;  %v115_v52 = vmax.f32 %v83_v32, %v99_v45  ;;  %v287_v56 = vpack.c.bf16 %v113_v48, %v112_v44  ;;  %v62_v57 = vmul.f32 %v261_v50, %v354_v1 }
   0xe   :  { %278 = vst [vmem:[%s441_s3] sm:$0xff] %v277_v47   ;;  %v265_v58 = vunpack.c.h.bf16 %v318_v41  ;;  %v268_v59 = vunpack.c.l.bf16 %v319_v46  ;;  %v84_v61 = vadd.f32 %v368_v7, %v61_v53  ;;  %v63_v62 = vmul.f32 %v264_v54, %v354_v1 }
   0xf   :  { %321 = vst [vmem:[%s441_s3 + $0x8] sm:$0xff] %v282_v51   ;;  %v292_v60 = vpack.c.bf16 %v115_v52, %v114_v49  ;;  %v269_v63 = vunpack.c.h.bf16 %v319_v46  ;;  %322 = vst [vmem:[%s441_s3 + $0x10] sm:$0xff] %v287_v56   ;;  %v85_v0 = vadd.f32 %v368_v7, %v62_v57  ;;  %v272_v4 = vunpack.c.l.bf16 %v320_v55 }
  0x10   :  { %v64_v2 = vmul.f32 %v265_v58, %v354_v1  ;;  %v65_v3 = vmul.f32 %v268_v59, %v354_v1  ;;  %v100_v5 = vmul.f32 0.2, %v84_v61  ;;  %v86_v6 = vadd.f32 %v368_v7, %v63_v62 }
  0x11   :  { %323 = vst [vmem:[%s441_s3 + $0x18] sm:$0xff] %v292_v60   ;;  %v66_v8 = vmul.f32 %v269_v63, %v354_v1  ;;  %v273_v9 = vunpack.c.h.bf16 %v320_v55  ;;  %v101_v10 = vmul.f32 0.2, %v85_v0  ;;  %v67_v13 = vmul.f32 %v272_v4, %v354_v1 }
  0x12   :  { %v87_v11 = vadd.f32 %v368_v7, %v64_v2  ;;  %v88_v12 = vadd.f32 %v368_v7, %v65_v3  ;;  %v116_v14 = vmax.f32 %v84_v61, %v100_v5  ;;  %v102_v15 = vmul.f32 0.2, %v86_v6 }
  0x13   :  { %v89_v16 = vadd.f32 %v368_v7, %v66_v8  ;;  %v68_v17 = vmul.f32 %v273_v9, %v354_v1  ;;  %v117_v18 = vmax.f32 %v85_v0, %v101_v10  ;;  %v90_v21 = vadd.f32 %v368_v7, %v67_v13 }
  0x14   :  { %v103_v19 = vmul.f32 0.2, %v87_v11  ;;  %v104_v20 = vmul.f32 0.2, %v88_v12  ;;  %v118_v22 = vmax.f32 %v86_v6, %v102_v15 }
  0x15   :  { %v105_v23 = vmul.f32 0.2, %v89_v16  ;;  %v91_v24 = vadd.f32 %v368_v7, %v68_v17  ;;  %v297_v25 = vpack.c.bf16 %v117_v18, %v116_v14  ;;  %v106_v28 = vmul.f32 0.2, %v90_v21 }
  0x16   :  { %v119_v26 = vmax.f32 %v87_v11, %v103_v19  ;;  %v120_v27 = vmax.f32 %v88_v12, %v104_v20 }
  0x17   :  { %v121_v29 = vmax.f32 %v89_v16, %v105_v23  ;;  %v107_v30 = vmul.f32 0.2, %v91_v24  ;;  %324 = vst [vmem:[%s441_s3 + $0x20] sm:$0xff] %v297_v25   ;;  %v122_v31 = vmax.f32 %v90_v21, %v106_v28 }
  0x18   :  { %v302_v1 = vpack.c.bf16 %v119_v26, %v118_v22 }
  0x19   :  { %v307_v32 = vpack.c.bf16 %v121_v29, %v120_v27  ;;  %v123_v33 = vmax.f32 %v91_v24, %v107_v30 }
  0x1a   :  { %325 = vst [vmem:[%s441_s3 + $0x28] sm:$0xff] %v302_v1  }
  0x1b   :  { %326 = vst [vmem:[%s441_s3 + $0x30] sm:$0xff] %v307_v32   ;;  %v312_v7 = vpack.c.bf16 %v123_v33, %v122_v31 }
  0x1d   :  { %327 = vst [vmem:[%s441_s3 + $0x38] sm:$0xff] %v312_v7  }

// kernel: net_d_forward.5
= control target key start
LH: loop header
LB: loop body
LE: loop exit
PB: predicated region body
PF: predicated region fallthrough
CT: control target
= control target key end

     0   :  { %s660_s1 = inlined_call_operand.vmem [shape: bf16[128,128], index: 1, kind: input, shape index: {}]   ;;  %s661_s0 = inlined_call_operand.vmem [shape: bf16[128,128], index: 0, kind: input, shape index: {}]   ;;  %s662_s2 = inlined_call_operand.vmem [shape: bf16[128,128], index: 2, kind: output, shape index: {0}]   ;;  %s663_s3 = inlined_call_operand.vmem [shape: f32[1,2,128], index: 3, kind: output, shape index: {1}]  }
   0x1   :  { %v546_v0 = vld [vmem:[%s660_s1] sm:$0xff]   ;;  %v547_v1 = vld [vmem:[%s660_s1 + $0x8] sm:$0xff]   ;;  %v548_v2 = vld [vmem:[%s660_s1 + $0x10] sm:$0xff]  }
   0x2   :  { %498 = vmatprep.subr.bf16.mxu0 %v546_v0  ;;  %530 = vmatprep.subr.bf16.mxu1 %v546_v0  ;;  %v549_v3 = vld [vmem:[%s660_s1 + $0x18] sm:$0xff]   ;;  %v554_v4 = vld [vmem:[%s661_s0] sm:$0xff]   ;;  %v551_v7 = vld [vmem:[%s660_s1 + $0x28] sm:$0xff]  }
   0x3   :  { %499 = vmatpush3.bf16.msra.mxu0 %v546_v0  ;;  %538 = vmatpush3.bf16.msra.mxu1 %v546_v0  ;;  %v550_v5 = vld [vmem:[%s660_s1 + $0x20] sm:$0xff]   ;;  %v552_v8 = vld [vmem:[%s660_s1 + $0x30] sm:$0xff]   ;;  %v553_v9 = vld [vmem:[%s660_s1 + $0x38] sm:$0xff]  }
   0x4   :  { %500 = vmatprep.subr.bf16.mxu0 %v547_v1  ;;  %531 = vmatprep.subr.bf16.mxu1 %v547_v1  ;;  %v558_v6 = vld [vmem:[%s661_s0 + $0x20] sm:$0xff]   ;;  %v555_v10 = vld [vmem:[%s661_s0 + $0x8] sm:$0xff]   ;;  %v556_v12 = vld [vmem:[%s661_s0 + $0x10] sm:$0xff]  }
   0x5   :  { %514 = vmatprep.mubr.bf16.mxu0 %v554_v4  ;;  %522 = vmatprep.mubr.bf16.mxu1 %v558_v6  ;;  %v559_v11 = vld [vmem:[%s661_s0 + $0x28] sm:$0xff]   ;;  %v560_v13 = vld [vmem:[%s661_s0 + $0x30] sm:$0xff]   ;;  %v557_v14 = vld [vmem:[%s661_s0 + $0x18] sm:$0xff]  }
   0x6   :  { %v561_v15 = vld [vmem:[%s661_s0 + $0x38] sm:$0xff]  }
   0x7   :  { %501 = vmatpush3.bf16.msra.mxu0 %v547_v1  ;;  %539 = vmatpush3.bf16.msra.mxu1 %v547_v1 }
   0x8   :  { %502 = vmatprep.subr.bf16.mxu0 %v548_v2  ;;  %532 = vmatprep.subr.bf16.mxu1 %v548_v2 }
   0xb   :  { %503 = vmatpush3.bf16.msra.mxu0 %v548_v2  ;;  %540 = vmatpush3.bf16.msra.mxu1 %v548_v2 }
   0xc   :  { %504 = vmatprep.subr.bf16.mxu0 %v549_v3  ;;  %533 = vmatprep.subr.bf16.mxu1 %v549_v3 }
   0xf   :  { %505 = vmatpush3.bf16.msra.mxu0 %v549_v3  ;;  %541 = vmatpush3.bf16.msra.mxu1 %v549_v3 }
  0x10   :  { %506 = vmatprep.subr.bf16.mxu0 %v550_v5  ;;  %534 = vmatprep.subr.bf16.mxu1 %v550_v5 }
  0x13   :  { %507 = vmatpush3.bf16.msra.mxu0 %v550_v5  ;;  %542 = vmatpush3.bf16.msra.mxu1 %v550_v5 }
  0x14   :  { %508 = vmatprep.subr.bf16.mxu0 %v551_v7  ;;  %535 = vmatprep.subr.bf16.mxu1 %v551_v7 }
  0x17   :  { %509 = vmatpush3.bf16.msra.mxu0 %v551_v7  ;;  %543 = vmatpush3.bf16.msra.mxu1 %v551_v7 }
  0x18   :  { %510 = vmatprep.subr.bf16.mxu0 %v552_v8  ;;  %536 = vmatprep.subr.bf16.mxu1 %v552_v8 }
  0x1b   :  { %511 = vmatpush3.bf16.msra.mxu0 %v552_v8  ;;  %544 = vmatpush3.bf16.msra.mxu1 %v552_v8 }
  0x1c   :  { %512 = vmatprep.subr.bf16.mxu0 %v553_v9  ;;  %537 = vmatprep.subr.bf16.mxu1 %v553_v9 }
  0x1f   :  { %513 = vmatpush3.bf16.msra.mxu0 %v553_v9  ;;  %545 = vmatpush3.bf16.msra.mxu1 %v553_v9 }
  0x22   :  { %515 = vmatmul.mubr.bf16.vlgmr.msra.gmra.mrb[0].mxu0 %v555_v10  ;;  %523 = vmatmul.mubr.bf16.vlgmr.msra.gmra.mrb[0].mxu1 %v559_v11 }
  0x23   :  { %518 = vmatprep.mubr.bf16.mxu0 %v556_v12  ;;  %526 = vmatprep.mubr.bf16.mxu1 %v560_v13 }
  0x2a   :  { %519 = vmatmul.mubr.bf16.gmra.mrb[4].mxu0 %v557_v14  ;;  %527 = vmatmul.mubr.bf16.gmra.mrb[4].mxu1 %v561_v15 }
  0xf5   :  { %v516_v16 = vpop.f32.mrb[0].mxu0  ;;  %v524_v17 = vpop.f32.mrb[0].mxu1 }
  0xf6   :  { %v176_v18 = vpop.f32.mrb[1].mxu0  ;;  %v208_v19 = vpop.f32.mrb[1].mxu1  ;;  %v343_v31 = vmul.f32 %v516_v16, %v516_v16  ;;  %v351_v3 = vmul.f32 %v524_v17, %v524_v17 }
  0xf7   :  { %v517_v20 = vpop.f32.mrb[2].mxu0  ;;  %v525_v21 = vpop.f32.mrb[2].mxu1  ;;  %v341_v22 = vmul.f32 %v176_v18, %v176_v18  ;;  %v349_v61 = vmul.f32 %v208_v19, %v208_v19 }
  0xf8   :  { %v443_v23 = vpack.c.bf16 %v517_v20, %v516_v16  ;;  %v179_v24 = vpop.f32.mrb[3].mxu0  ;;  %v463_v25 = vpack.c.bf16 %v525_v21, %v524_v17  ;;  %v211_v26 = vpop.f32.mrb[3].mxu1  ;;  %v344_v34 = vmul.f32 %v517_v20, %v517_v20  ;;  %v352_v6 = vmul.f32 %v525_v21, %v525_v21 }
  0xf9   :  { %v438_v27 = vpack.c.bf16 %v179_v24, %v176_v18  ;;  %v319_v28 = vadd.f32 %v179_v24, %v176_v18  ;;  %v342_v29 = vmul.f32 %v179_v24, %v179_v24  ;;  %v458_v30 = vpack.c.bf16 %v211_v26, %v208_v19 }
  0xfa   :  { %475 = vst [vmem:[%s662_s2 + $0x8] sm:$0xff] %v443_v23   ;;  %479 = vst [vmem:[%s662_s2 + $0x28] sm:$0xff] %v463_v25   ;;  %v350_v2 = vmul.f32 %v211_v26, %v211_v26 }
  0xfb   :  { %439 = vst [vmem:[%s662_s2] sm:$0xff] %v438_v27   ;;  %v320_v32 = vadd.f32 %v516_v16, %v319_v28  ;;  %v357_v33 = vadd.f32 %v342_v29, %v341_v22  ;;  %478 = vst [vmem:[%s662_s2 + $0x20] sm:$0xff] %v458_v30  }
  0xfd   :  { %v358_v35 = vadd.f32 %v357_v33, %v343_v31  ;;  %v520_v36 = vpop.f32.mrb[4].mxu0  ;;  %v321_v37 = vadd.f32 %v517_v20, %v320_v32  ;;  %v528_v38 = vpop.f32.mrb[4].mxu1 }
  0xfe   :  { %v192_v39 = vpop.f32.mrb[5].mxu0  ;;  %v224_v40 = vpop.f32.mrb[5].mxu1  ;;  %v347_v55 = vmul.f32 %v520_v36, %v520_v36  ;;  %v355_v15 = vmul.f32 %v528_v38, %v528_v38 }
  0xff   :  { %v322_v41 = vadd.f32 %v321_v37, %v192_v39  ;;  %v345_v42 = vmul.f32 %v192_v39, %v192_v39  ;;  %v359_v43 = vadd.f32 %v358_v35, %v344_v34  ;;  %v521_v44 = vpop.f32.mrb[6].mxu0  ;;  %v529_v45 = vpop.f32.mrb[6].mxu1  ;;  %v353_v9 = vmul.f32 %v224_v40, %v224_v40 }
 0x100   :  { %v453_v46 = vpack.c.bf16 %v521_v44, %v520_v36  ;;  %v195_v47 = vpop.f32.mrb[7].mxu0  ;;  %v473_v48 = vpack.c.bf16 %v529_v45, %v528_v38  ;;  %v227_v49 = vpop.f32.mrb[7].mxu1  ;;  %v348_v58 = vmul.f32 %v521_v44, %v521_v44 }
 0x101   :  { %v360_v50 = vadd.f32 %v359_v43, %v345_v42  ;;  %v448_v51 = vpack.c.bf16 %v195_v47, %v192_v39  ;;  %v323_v52 = vadd.f32 %v322_v41, %v195_v47  ;;  %v346_v53 = vmul.f32 %v195_v47, %v195_v47 }
 0x102   :  { %477 = vst [vmem:[%s662_s2 + $0x18] sm:$0xff] %v453_v46   ;;  %481 = vst [vmem:[%s662_s2 + $0x38] sm:$0xff] %v473_v48   ;;  %v468_v54 = vpack.c.bf16 %v227_v49, %v224_v40  ;;  %v354_v14 = vmul.f32 %v227_v49, %v227_v49 }
 0x103   :  { %476 = vst [vmem:[%s662_s2 + $0x10] sm:$0xff] %v448_v51   ;;  %v324_v56 = vadd.f32 %v520_v36, %v323_v52  ;;  %v361_v57 = vadd.f32 %v360_v50, %v346_v53 }
 0x104   :  { %480 = vst [vmem:[%s662_s2 + $0x30] sm:$0xff] %v468_v54  }
 0x105   :  { %v362_v59 = vadd.f32 %v361_v57, %v347_v55  ;;  %v325_v60 = vadd.f32 %v521_v44, %v324_v56 }
 0x107   :  { %v326_v62 = vadd.f32 %v325_v60, %v208_v19  ;;  %v363_v63 = vadd.f32 %v362_v59, %v348_v58  ;;  %v356_v19 = vmul.f32 %v529_v45, %v529_v45 }
 0x109   :  { %v364_v0 = vadd.f32 %v363_v63, %v349_v61  ;;  %v327_v1 = vadd.f32 %v326_v62, %v211_v26 }
 0x10b   :  { %v328_v4 = vadd.f32 %v524_v17, %v327_v1  ;;  %v365_v5 = vadd.f32 %v364_v0, %v350_v2 }
 0x10d   :  { %v366_v7 = vadd.f32 %v365_v5, %v351_v3  ;;  %v329_v8 = vadd.f32 %v525_v21, %v328_v4 }
 0x10f   :  { %v330_v10 = vadd.f32 %v329_v8, %v224_v40  ;;  %v367_v11 = vadd.f32 %v366_v7, %v352_v6 }
 0x111   :  { %v368_v12 = vadd.f32 %v367_v11, %v353_v9  ;;  %v331_v13 = vadd.f32 %v330_v10, %v227_v49 }
 0x113   :  { %v332_v16 = vadd.f32 %v528_v38, %v331_v13  ;;  %v369_v18 = vadd.f32 %v368_v12, %v354_v14 }
 0x115   :  { %v333_v20 = vadd.f32 %v529_v45, %v332_v16  ;;  %v370_v22 = vadd.f32 %v369_v18, %v355_v15 }
 0x117   :  { %v334_v23 = vrot.slane %v333_v20, 4  ;;  %v371_v24 = vadd.f32 %v370_v22, %v356_v19 }
 0x119   :  { %v335_v25 = vadd.f32 %v334_v23, %v333_v20  ;;  %v372_v17 = vrot.slane %v371_v24, 4 }
 0x11b   :  { %v336_v26 = vrot.slane %v335_v25, 2  ;;  %v373_v27 = vadd.f32 %v372_v17, %v371_v24 }
 0x11d   :  { %v337_v28 = vadd.f32 %v336_v26, %v335_v25  ;;  %v374_v21 = vrot.slane %v373_v27, 2 }
 0x11f   :  { %v338_v29 = vrot.slane %v337_v28, 1  ;;  %v375_v30 = vadd.f32 %v374_v21, %v373_v27 }
 0x121   :  { %v339_v31 = vadd.f32 %v338_v29, %v337_v28  ;;  %v376_v32 = vrot.slane %v375_v30, 1 }
 0x123   :  { %340 = vst [vmem:[%s663_s3] sm:$0x1] %v339_v31  ;;  %v377_v33 = vadd.f32 %v376_v32, %v375_v30 }
 0x125   :  { %378 = vst [vmem:[%s663_s3 + $0x1] sm:$0x1] %v377_v33 }

// kernel: net_d_forward.7
= control target key start
LH: loop header
LB: loop body
LE: loop exit
PB: predicated region body
PF: predicated region fallthrough
CT: control target
= control target key end

     0   :  { %s1175_s1 = inlined_call_operand.vmem [shape: bf16[1024,128], index: 1, kind: input, shape index: {}]   ;;  %s1176_s0 = inlined_call_operand.vmem [shape: bf16[8,1024], index: 0, kind: input, shape index: {}]   ;;  %s1177_s2 = inlined_call_operand.vmem [shape: f32[8,128], index: 2, kind: output, shape index: {}]  }
   0x1   :  { %v881_v0 = vld [vmem:[%s1175_s1 + $0x40] sm:$0xff]   ;;  %v885_v4 = vld [vmem:[%s1175_s1 + $0x48] sm:$0xff]   ;;  %v889_v8 = vld [vmem:[%s1175_s1 + $0x50] sm:$0xff]  }
   0x2   :  { %v882_v1 = vld [vmem:[%s1175_s1 + $0xc0] sm:$0xff]   ;;  %793 = vmatprep.subr.bf16.mxu0 %v881_v0  ;;  %v886_v5 = vld [vmem:[%s1175_s1 + $0xc8] sm:$0xff]   ;;  %v890_v9 = vld [vmem:[%s1175_s1 + $0xd0] sm:$0xff]  }
   0x3   :  { %v883_v2 = vld [vmem:[%s1175_s1] sm:$0xff]   ;;  %815 = vmatprep.subr.bf16.mxu1 %v882_v1  ;;  %v887_v6 = vld [vmem:[%s1175_s1 + $0x8] sm:$0xff]   ;;  %v891_v10 = vld [vmem:[%s1175_s1 + $0x10] sm:$0xff]  }
   0x4   :  { %v884_v3 = vld [vmem:[%s1175_s1 + $0x80] sm:$0xff]   ;;  %794 = vmatpush3.bf16.msra.mxu0 %v883_v2  ;;  %v888_v7 = vld [vmem:[%s1175_s1 + $0x88] sm:$0xff]   ;;  %v892_v11 = vld [vmem:[%s1175_s1 + $0x90] sm:$0xff]  }
   0x5   :  { %816 = vmatpush3.bf16.msra.mxu1 %v884_v3  ;;  %795 = vmatprep.subr.bf16.mxu0 %v885_v4  ;;  %v893_v12 = vld [vmem:[%s1175_s1 + $0x58] sm:$0xff]   ;;  %v897_v16 = vld [vmem:[%s1175_s1 + $0x60] sm:$0xff]   ;;  %v901_v20 = vld [vmem:[%s1175_s1 + $0x68] sm:$0xff]  }
   0x6   :  { %817 = vmatprep.subr.bf16.mxu1 %v886_v5  ;;  %v894_v13 = vld [vmem:[%s1175_s1 + $0xd8] sm:$0xff]   ;;  %v898_v17 = vld [vmem:[%s1175_s1 + $0xe0] sm:$0xff]   ;;  %v902_v21 = vld [vmem:[%s1175_s1 + $0xe8] sm:$0xff]  }
   0x7   :  { %v895_v14 = vld [vmem:[%s1175_s1 + $0x18] sm:$0xff]   ;;  %v899_v18 = vld [vmem:[%s1175_s1 + $0x20] sm:$0xff]   ;;  %v903_v22 = vld [vmem:[%s1175_s1 + $0x28] sm:$0xff]  }
   0x8   :  { %796 = vmatpush3.bf16.msra.mxu0 %v887_v6  ;;  %v896_v15 = vld [vmem:[%s1175_s1 + $0x98] sm:$0xff]   ;;  %v900_v19 = vld [vmem:[%s1175_s1 + $0xa0] sm:$0xff]   ;;  %v904_v23 = vld [vmem:[%s1175_s1 + $0xa8] sm:$0xff]  }
   0x9   :  { %818 = vmatpush3.bf16.msra.mxu1 %v888_v7  ;;  %797 = vmatprep.subr.bf16.mxu0 %v889_v8  ;;  %v905_v24 = vld [vmem:[%s1175_s1 + $0x70] sm:$0xff]   ;;  %v909_v28 = vld [vmem:[%s1175_s1 + $0x78] sm:$0xff]   ;;  %v12_v32 = vld [vmem:[%s1176_s0] sm:$0xff] }
   0xa   :  { %819 = vmatprep.subr.bf16.mxu1 %v890_v9  ;;  %v906_v25 = vld [vmem:[%s1175_s1 + $0xf0] sm:$0xff]   ;;  %v910_v29 = vld [vmem:[%s1175_s1 + $0xf8] sm:$0xff]   ;;  %v13_v33 = vld [vmem:[%s1176_s0 + $0x8] sm:$0xff]  ;;  %v721_v34 = vcombine.low %v12_v32, %v12_v32  ;;  %v722_v35 = vcombine.high %v12_v32, %v12_v32 }
   0xb   :  { %v907_v26 = vld [vmem:[%s1175_s1 + $0x30] sm:$0xff]   ;;  %v911_v30 = vld [vmem:[%s1175_s1 + $0x38] sm:$0xff]   ;;  %v723_v36 = vcombine.low %v13_v33, %v13_v33  ;;  %v724_v37 = vcombine.high %v13_v33, %v13_v33  ;;  %v917_v38 = vld [vmem:[%s1175_s1 + $0x140] sm:$0xff]  }
   0xc   :  { %798 = vmatpush3.bf16.msra.mxu0 %v891_v10  ;;  %v908_v27 = vld [vmem:[%s1175_s1 + $0xb0] sm:$0xff]   ;;  %v912_v31 = vld [vmem:[%s1175_s1 + $0xb8] sm:$0xff]   ;;  %v918_v39 = vld [vmem:[%s1175_s1 + $0x1c0] sm:$0xff]   ;;  %588 = vmatprep.mubr.bf16.mxu0 %v722_v35 }
   0xd   :  { %820 = vmatpush3.bf16.msra.mxu1 %v892_v11  ;;  %799 = vmatprep.subr.bf16.mxu0 %v893_v12  ;;  %v919_v40 = vld [vmem:[%s1175_s1 + $0x100] sm:$0xff]   ;;  %v921_v42 = vld [vmem:[%s1175_s1 + $0x148] sm:$0xff]   ;;  %v925_v46 = vld [vmem:[%s1175_s1 + $0x150] sm:$0xff]  }
   0xe   :  { %821 = vmatprep.subr.bf16.mxu1 %v894_v13  ;;  %628 = vmatprep.mubr.bf16.mxu1 %v724_v37  ;;  %v920_v41 = vld [vmem:[%s1175_s1 + $0x180] sm:$0xff]   ;;  %v922_v43 = vld [vmem:[%s1175_s1 + $0x1c8] sm:$0xff]   ;;  %v926_v47 = vld [vmem:[%s1175_s1 + $0x1d0] sm:$0xff]  }
   0xf   :  { %v923_v44 = vld [vmem:[%s1175_s1 + $0x108] sm:$0xff]   ;;  %v927_v48 = vld [vmem:[%s1175_s1 + $0x110] sm:$0xff]   ;;  %v929_v50 = vld [vmem:[%s1175_s1 + $0x158] sm:$0xff]  }
  0x10   :  { %800 = vmatpush3.bf16.msra.mxu0 %v895_v14  ;;  %v924_v45 = vld [vmem:[%s1175_s1 + $0x188] sm:$0xff]   ;;  %v928_v49 = vld [vmem:[%s1175_s1 + $0x190] sm:$0xff]   ;;  %v930_v51 = vld [vmem:[%s1175_s1 + $0x1d8] sm:$0xff]  }
  0x11   :  { %822 = vmatpush3.bf16.msra.mxu1 %v896_v15  ;;  %801 = vmatprep.subr.bf16.mxu0 %v897_v16  ;;  %v931_v52 = vld [vmem:[%s1175_s1 + $0x118] sm:$0xff]   ;;  %v933_v54 = vld [vmem:[%s1175_s1 + $0x160] sm:$0xff]   ;;  %v937_v58 = vld [vmem:[%s1175_s1 + $0x168] sm:$0xff]  }
  0x12   :  { %823 = vmatprep.subr.bf16.mxu1 %v898_v17  ;;  %v932_v53 = vld [vmem:[%s1175_s1 + $0x198] sm:$0xff]   ;;  %v934_v55 = vld [vmem:[%s1175_s1 + $0x1e0] sm:$0xff]   ;;  %v938_v59 = vld [vmem:[%s1175_s1 + $0x1e8] sm:$0xff]  }
  0x13   :  { %v935_v56 = vld [vmem:[%s1175_s1 + $0x120] sm:$0xff]   ;;  %v939_v60 = vld [vmem:[%s1175_s1 + $0x128] sm:$0xff]   ;;  %v941_v62 = vld [vmem:[%s1175_s1 + $0x170] sm:$0xff]  }
  0x14   :  { %802 = vmatpush3.bf16.msra.mxu0 %v899_v18  ;;  %v936_v57 = vld [vmem:[%s1175_s1 + $0x1a0] sm:$0xff]   ;;  %v940_v61 = vld [vmem:[%s1175_s1 + $0x1a8] sm:$0xff]   ;;  %v942_v63 = vld [vmem:[%s1175_s1 + $0x1f0] sm:$0xff]  }
  0x15   :  { %824 = vmatpush3.bf16.msra.mxu1 %v900_v19  ;;  %803 = vmatprep.subr.bf16.mxu0 %v901_v20  ;;  %v943_v0 = vld [vmem:[%s1175_s1 + $0x130] sm:$0xff]   ;;  %v945_v2 = vld [vmem:[%s1175_s1 + $0x178] sm:$0xff]  }
  0x16   :  { %825 = vmatprep.subr.bf16.mxu1 %v902_v21  ;;  %v944_v1 = vld [vmem:[%s1175_s1 + $0x1b0] sm:$0xff]   ;;  %v946_v3 = vld [vmem:[%s1175_s1 + $0x1f8] sm:$0xff]  }
  0x17   :  { %v947_v4 = vld [vmem:[%s1175_s1 + $0x138] sm:$0xff]   ;;  %v14_v6 = vld [vmem:[%s1176_s0 + $0x10] sm:$0xff] }
  0x18   :  { %804 = vmatpush3.bf16.msra.mxu0 %v903_v22  ;;  %v948_v5 = vld [vmem:[%s1175_s1 + $0x1b8] sm:$0xff]   ;;  %v725_v7 = vcombine.low %v14_v6, %v14_v6  ;;  %v726_v8 = vcombine.high %v14_v6, %v14_v6 }
  0x19   :  { %826 = vmatpush3.bf16.msra.mxu1 %v904_v23  ;;  %805 = vmatprep.subr.bf16.mxu0 %v905_v24  ;;  %v15_v9 = vld [vmem:[%s1176_s0 + $0x18] sm:$0xff] }
  0x1a   :  { %827 = vmatprep.subr.bf16.mxu1 %v906_v25  ;;  %v727_v10 = vcombine.low %v15_v9, %v15_v9  ;;  %v728_v11 = vcombine.high %v15_v9, %v15_v9 }
  0x1c   :  { %806 = vmatpush3.bf16.msra.mxu0 %v907_v26 }
  0x1d   :  { %828 = vmatpush3.bf16.msra.mxu1 %v908_v27  ;;  %807 = vmatprep.subr.bf16.mxu0 %v909_v28 }
  0x1e   :  { %829 = vmatprep.subr.bf16.mxu1 %v910_v29 }
  0x20   :  { %808 = vmatpush3.bf16.msra.mxu0 %v911_v30 }
  0x21   :  { %830 = vmatpush3.bf16.msra.mxu1 %v912_v31  ;;  %837 = vmatprep.subr.bf16.mxu0 %v917_v38 }
  0x22   :  { %859 = vmatprep.subr.bf16.mxu1 %v918_v39 }
  0x23   :  { %589 = vmatmul.mubr.bf16.vlgmr.msra.gmra.mrb[0].mxu0 %v721_v34 }
  0x24   :  { %629 = vmatmul.mubr.bf16.vlgmr.msra.gmra.mrb[0].mxu1 %v723_v36  ;;  %838 = vmatpush3.bf16.msra.mxu0 %v919_v40 }
  0x25   :  { %860 = vmatpush3.bf16.msra.mxu1 %v920_v41  ;;  %839 = vmatprep.subr.bf16.mxu0 %v921_v42 }
  0x26   :  { %861 = vmatprep.subr.bf16.mxu1 %v922_v43  ;;  %668 = vmatprep.mubr.bf16.mxu0 %v726_v8 }
  0x27   :  { %708 = vmatprep.mubr.bf16.mxu1 %v728_v11 }
  0x28   :  { %840 = vmatpush3.bf16.msra.mxu0 %v923_v44 }
  0x29   :  { %862 = vmatpush3.bf16.msra.mxu1 %v924_v45  ;;  %841 = vmatprep.subr.bf16.mxu0 %v925_v46 }
  0x2a   :  { %863 = vmatprep.subr.bf16.mxu1 %v926_v47 }
  0x2c   :  { %842 = vmatpush3.bf16.msra.mxu0 %v927_v48 }
  0x2d   :  { %864 = vmatpush3.bf16.msra.mxu1 %v928_v49  ;;  %843 = vmatprep.subr.bf16.mxu0 %v929_v50 }
  0x2e   :  { %865 = vmatprep.subr.bf16.mxu1 %v930_v51 }
  0x30   :  { %844 = vmatpush3.bf16.msra.mxu0 %v931_v52 }
  0x31   :  { %866 = vmatpush3.bf16.msra.mxu1 %v932_v53  ;;  %845 = vmatprep.subr.bf16.mxu0 %v933_v54 }
  0x32   :  { %867 = vmatprep.subr.bf16.mxu1 %v934_v55 }
  0x34   :  { %846 = vmatpush3.bf16.msra.mxu0 %v935_v56 }
  0x35   :  { %868 = vmatpush3.bf16.msra.mxu1 %v936_v57  ;;  %847 = vmatprep.subr.bf16.mxu0 %v937_v58 }
  0x36   :  { %869 = vmatprep.subr.bf16.mxu1 %v938_v59 }
  0x38   :  { %848 = vmatpush3.bf16.msra.mxu0 %v939_v60 }
  0x39   :  { %870 = vmatpush3.bf16.msra.mxu1 %v940_v61  ;;  %849 = vmatprep.subr.bf16.mxu0 %v941_v62 }
  0x3a   :  { %871 = vmatprep.subr.bf16.mxu1 %v942_v63 }
  0x3c   :  { %850 = vmatpush3.bf16.msra.mxu0 %v943_v0 }
  0x3d   :  { %872 = vmatpush3.bf16.msra.mxu1 %v944_v1  ;;  %851 = vmatprep.subr.bf16.mxu0 %v945_v2 }
  0x3e   :  { %873 = vmatprep.subr.bf16.mxu1 %v946_v3 }
  0x40   :  { %852 = vmatpush3.bf16.msra.mxu0 %v947_v4 }
  0x41   :  { %874 = vmatpush3.bf16.msra.mxu1 %v948_v5 }
  0x43   :  { %669 = vmatmul.mubr.bf16.vlgmr.msra.gmra.mrb[4].mxu0 %v725_v7 }
  0x44   :  { %709 = vmatmul.mubr.bf16.vlgmr.msra.gmra.mrb[4].mxu1 %v727_v10 }
  0xf6   :  { %v809_v12 = vpop.f32.mrb[0].mxu0 }
  0xf7   :  { %v831_v13 = vpop.f32.mrb[0].mxu1  ;;  %v810_v14 = vpop.f32.mrb[1].mxu0 }
  0xf8   :  { %v832_v15 = vpop.f32.mrb[1].mxu1  ;;  %v811_v16 = vadd.f32 %v810_v14, %v809_v12  ;;  %v812_v18 = vpop.f32.mrb[2].mxu0 }
  0xf9   :  { %v833_v17 = vadd.f32 %v832_v15, %v831_v13  ;;  %v834_v19 = vpop.f32.mrb[2].mxu1  ;;  %v813_v20 = vpop.f32.mrb[3].mxu0 }
  0xfa   :  { %v835_v21 = vpop.f32.mrb[3].mxu1 }
  0xfb   :  { %v631_v22 = vadd.f32 %v833_v17, %v811_v16 }
 0x116   :  { %v853_v23 = vpop.f32.mrb[4].mxu0 }
 0x117   :  { %v875_v24 = vpop.f32.mrb[4].mxu1  ;;  %v854_v25 = vpop.f32.mrb[5].mxu0 }
 0x118   :  { %v876_v26 = vpop.f32.mrb[5].mxu1  ;;  %v855_v27 = vadd.f32 %v854_v25, %v853_v23  ;;  %v856_v29 = vpop.f32.mrb[6].mxu0 }
 0x119   :  { %v877_v28 = vadd.f32 %v876_v26, %v875_v24  ;;  %v878_v30 = vpop.f32.mrb[6].mxu1  ;;  %v857_v31 = vpop.f32.mrb[7].mxu0 }
 0x11a   :  { %v879_v32 = vpop.f32.mrb[7].mxu1  ;;  %v671_v33 = vadd.f32 %v855_v27, %v631_v22 }
 0x11c   :  { %v711_v34 = vadd.f32 %v877_v28, %v671_v33 }
 0x11e   :  { %716 = vst [vmem:[%s1177_s2] sm:$0xff] %v711_v34 }

</bundles_post_ra>
